<compile_context>
chip_gen: v7x
topology: tpu7x:2x2x1
jax: 0.10.0
libtpu: 0.0.40
codegen_flags: <defaults>
</compile_context>

<pallas_src>
import math
import functools

import jax
import jax.numpy as jnp
from jax.experimental import pallas as pl
from jax.experimental.pallas import tpu as pltpu


def _mab_kernel(q_ref, k_ref,
                wq_ref, bq_ref, wkv_ref, bkv_ref, wo_ref, bo_ref,
                mask_ref, seg_ref,
                o_ref, *, num_heads, block_b, n_q, n_k):
    H, Bt, Nq, Nk = num_heads, block_b, n_q, n_k
    dim_V = wq_ref.shape[1]
    scale = 1.0 / math.sqrt(dim_V)          # torch scales by sqrt(dim_V), not sqrt(dh)

    Xq = q_ref[...]                          # (Bt*Nq, dim_Q)
    Xk = k_ref[...]                          # (Bt*Nk, dim_K)

    # Input projections: two lane-dense MXU matmuls (K and V fused), f32 accumulate.
    q2 = jnp.dot(Xq, wq_ref[...], preferred_element_type=jnp.float32) + bq_ref[...]
    kv2 = jnp.dot(Xk, wkv_ref[...], preferred_element_type=jnp.float32) + bkv_ref[...]
    k2 = kv2[:, :dim_V]                      # vreg-aligned lane slice (128 boundary)
    v2 = kv2[:, dim_V:]

    # Batch-major 3-D views: leading <-> second-minor reshapes only (8-aligned),
    # no lane/sublane relayout, no transposes.
    q3 = q2.reshape(Bt, Nq, dim_V)
    k3 = k2.reshape(Bt, Nk, dim_V)
    v3 = v2.reshape(Bt, Nk, dim_V)

    # Heads WITHOUT per-head slicing: replicate K/V rows H times along a
    # lane-dense row axis j = h*Nk + k and zero off-head columns with a static
    # block-diagonal mask (built once in the wrapper).  The batched einsums
    # below then compute all heads at once with MXU-friendly contraction dims.
    mask = mask_ref[...]                                         # (H*Nk, dim_V), 0/1
    k_bd = jnp.concatenate([k3] * H, axis=1) * mask              # (Bt, H*Nk, dim_V)
    v_bd = jnp.concatenate([v3] * H, axis=1) * mask              # (Bt, H*Nk, dim_V)

    # Scores for all heads: (Bt, Nq, H*Nk); contraction over dim_V.
    s = jnp.einsum("bqc,bjc->bqj", q3, k_bd,
                   preferred_element_type=jnp.float32) * scale

    # Per-head softmax over each Nk-wide segment of the last axis.  Subtracting
    # the per-row global max is valid (same constant within every segment); the
    # per-segment sums are broadcast back with one small matmul against a
    # segment-indicator matrix (no minor-dim reshape needed).
    s2 = s.reshape(Bt * Nq, H * Nk)
    p2 = jnp.exp(s2 - jnp.max(s2, axis=-1, keepdims=True))
    denom2 = jnp.dot(p2, seg_ref[...], preferred_element_type=jnp.float32)
    a3 = (p2 * pl.reciprocal(denom2, approx=True)).reshape(Bt, Nq, H * Nk)

    # Residual (projected q) + attention output; the block-diagonal V mask
    # re-merges heads directly into lane position, so no head concat is needed.
    o3 = q3 + jnp.einsum("bqj,bjc->bqc", a3, v_bd,
                         preferred_element_type=jnp.float32)     # (Bt, Nq, dim_V)

    # O = O + relu(fc_o(O)); lane-dense store when dim_V is a multiple of 128.
    O = o3.reshape(Bt * Nq, dim_V)
    proj = jnp.dot(O, wo_ref[...], preferred_element_type=jnp.float32) + bo_ref[...]
    o_ref[...] = (O + jnp.maximum(proj, 0.0)).astype(o_ref.dtype)


def _num_parallel_slabs():
    """2 TensorCores visible to one Pallas program on v7x / v4 / v5p, else 1."""
    kind = getattr(jax.devices()[0], "device_kind", "").lower()
    return 2 if any(t in kind for t in ("v7", "v4", "v5p")) else 1


def _pick_block_b(B, Nq, Nk, n_slabs, max_rows):
    """Batch-block size: exactly n_slabs grid steps when possible, else the
    largest divisor of B whose row slabs fit max_rows (fewest serial steps)."""
    divisors = [d for d in range(1, B + 1) if B % d == 0]

    def ok(d):
        aligned = ((d * Nq) % 8 == 0 and (d * Nk) % 8 == 0) or d == B
        return aligned and d * max(Nq, Nk) <= max_rows

    if B % n_slabs == 0:
        target = B // n_slabs
        if target in divisors and ok(target):
            return target
    fitting = [d for d in divisors if ok(d)]
    return max(fitting) if fitting else B


def _pad_bytes(r, c):
    """f32 VMEM footprint of a 2-D block padded to the (8, 128) tile."""
    return (-(-r // 8) * 8) * (-(-c // 128) * 128) * 4


def mab_forward(Q, K, params, *, num_heads, block_b=None):
    B, Nq, dim_Q = Q.shape
    Bk, Nk, dim_K = K.shape
    assert Bk == B, "Q and K must share the batch dimension"
    dim_V = params["wq"].shape[1]
    assert dim_V % num_heads == 0, "dim_V must be divisible by num_heads"
    dh = dim_V // num_heads

    n_slabs = _num_parallel_slabs()
    max_rows = 384 if n_slabs == 2 else 512          # generation-aware slab cap
    Bt = block_b if block_b is not None else _pick_block_b(B, Nq, Nk, n_slabs, max_rows)
    assert B % Bt == 0, "block_b must divide the batch size"
    J = num_heads * Nk

    # Wrapper-side packing (free XLA ops, keeps the kernel relayout-free).
    Qf = Q.reshape(B * Nq, dim_Q)
    Kf = K.reshape(B * Nk, dim_K)
    wkv = jnp.concatenate([params["wk"], params["wv"]], axis=1)          # (dim_K, 2*dim_V)
    bkv = jnp.concatenate([params["bk"], params["bv"]]).reshape(1, 2 * dim_V)
    bq = params["bq"].reshape(1, dim_V)
    bo = params["bo"].reshape(1, dim_V)

    # Static head bookkeeping, computed once in the wrapper:
    #   mask[j, c] = 1 iff column c belongs to head j // Nk   (block diagonal)
    #   seg[j, l]  = 1 iff j and l lie in the same head segment
    head_of_row = jnp.arange(J) // Nk
    head_of_col = jnp.arange(dim_V) // dh
    mask = (head_of_row[:, None] == head_of_col[None, :]).astype(jnp.float32)
    seg = (head_of_row[:, None] == head_of_row[None, :]).astype(jnp.float32)

    kernel = functools.partial(_mab_kernel, num_heads=num_heads,
                               block_b=Bt, n_q=Nq, n_k=Nk)

    # Explicit VMEM budget from actual tile sizes; cap below v7x's 64 MiB/TC.
    blk = (_pad_bytes(Bt * Nq, dim_Q) + _pad_bytes(Bt * Nk, dim_K)
           + _pad_bytes(Bt * Nq, dim_V))
    wgt = (_pad_bytes(dim_Q, dim_V) + _pad_bytes(dim_K, 2 * dim_V)
           + _pad_bytes(dim_V, dim_V) + _pad_bytes(J, dim_V) + _pad_bytes(J, J)
           + 3 * _pad_bytes(1, 2 * dim_V))
    scratch = 6 * _pad_bytes(Bt * J, dim_V) + 4 * _pad_bytes(Bt * Nq, J)
    vmem_limit = int(min(48 * 2 ** 20,
                         max(8 * 2 ** 20, 2 * (2 * blk + 2 * wgt) + 2 * scratch)))

    const = lambda b: (0, 0)   # resident weights / masks (default double buffering)
    out2d = pl.pallas_call(
        kernel,
        out_shape=jax.ShapeDtypeStruct((B * Nq, dim_V), Q.dtype),
        grid=(B // Bt,),
        in_specs=[
            pl.BlockSpec((Bt * Nq, dim_Q), lambda b: (b, 0)),   # Q slab
            pl.BlockSpec((Bt * Nk, dim_K), lambda b: (b, 0)),   # K slab
            pl.BlockSpec((dim_Q, dim_V), const),                # wq
            pl.BlockSpec((1, dim_V), const),                    # bq
            pl.BlockSpec((dim_K, 2 * dim_V), const),            # wkv
            pl.BlockSpec((1, 2 * dim_V), const),                # bkv
            pl.BlockSpec((dim_V, dim_V), const),                # wo
            pl.BlockSpec((1, dim_V), const),                    # bo
            pl.BlockSpec((J, dim_V), const),                    # head block mask
            pl.BlockSpec((J, J), const),                        # segment matrix
        ],
        out_specs=pl.BlockSpec((Bt * Nq, dim_V), lambda b: (b, 0)),
        compiler_params=pltpu.CompilerParams(
            dimension_semantics=("parallel",),
            vmem_limit_bytes=vmem_limit),
    )(Qf, Kf, params["wq"], bq, wkv, bkv, params["wo"], bo, mask, seg)

    return out2d.reshape(B, Nq, dim_V)


def mab_reference(Q, K, params, *, num_heads):
    """Pure-JAX reference mirroring the PyTorch forward (ln=False)."""
    dim_V = params["wq"].shape[1]
    B, Nq, _ = Q.shape
    dh = dim_V // num_heads

    q = Q @ params["wq"] + params["bq"]
    k = K @ params["wk"] + params["bk"]
    v = K @ params["wv"] + params["bv"]

    def split_heads(x):
        Bx, N, _ = x.shape
        return x.reshape(Bx, N, num_heads, dh).transpose(0, 2, 1, 3)   # (B,H,N,dh)

    qh, kh, vh = split_heads(q), split_heads(k), split_heads(v)
    s = jnp.einsum("bhqd,bhkd->bhqk", qh, kh) / math.sqrt(dim_V)
    a = jax.nn.softmax(s, axis=-1)
    o = qh + jnp.einsum("bhqk,bhkd->bhqd", a, vh)
    o = o.transpose(0, 2, 1, 3).reshape(B, Nq, dim_V)
    return o + jax.nn.relu(o @ params["wo"] + params["bo"])


if __name__ == "__main__":
    # Small, NCES-SetTransformer-like shapes: dim_V=128 keeps the output store
    # lane-dense; B=8 divides cleanly into 1 slab (v5e/v6e) or 2 slabs (v7x).
    B, Nq, Nk = 8, 8, 16
    dim_Q, dim_K, dim_V, num_heads = 32, 24, 128, 4

    key = jax.random.PRNGKey(0)
    ks = jax.random.split(key, 10)

    def lin_init(kw, kb, fan_in, fan_out):
        bound = 1.0 / math.sqrt(fan_in)
        w = jax.random.uniform(kw, (fan_in, fan_out), jnp.float32, -bound, bound)
        b = jax.random.uniform(kb, (fan_out,), jnp.float32, -bound, bound)
        return w, b

    wq, bq = lin_init(ks[0], ks[1], dim_Q, dim_V)
    wk, bk = lin_init(ks[2], ks[3], dim_K, dim_V)
    wv, bv = lin_init(ks[4], ks[5], dim_K, dim_V)
    wo, bo = lin_init(ks[6], ks[7], dim_V, dim_V)
    params = dict(wq=wq, bq=bq, wk=wk, bk=bk, wv=wv, bv=bv, wo=wo, bo=bo)

    Q = jax.random.normal(ks[8], (B, Nq, dim_Q), jnp.float32)
    K = jax.random.normal(ks[9], (B, Nk, dim_K), jnp.float32)

    out = jax.block_until_ready(mab_forward(Q, K, params, num_heads=num_heads))

    ref = mab_reference(Q, K, params, num_heads=num_heads)
    assert out.shape == (B, Nq, dim_V)
    max_err = float(jnp.max(jnp.abs(out - ref)))
    assert jnp.allclose(out, ref, atol=2e-3, rtol=2e-3), f"mismatch vs reference ({max_err})"

    print("KERNEL_OK")
</pallas_src>

<mosaic_0001>
module attributes {stable_mosaic.version = 11 : i64} {
  func.func @_mab_kernel(%arg0: i32, %arg1: memref<64x32xf32, #tpu.memory_space<vmem>>, %arg2: memref<128x24xf32, #tpu.memory_space<vmem>>, %arg3: memref<32x128xf32, #tpu.memory_space<vmem>>, %arg4: memref<1x128xf32, #tpu.memory_space<vmem>>, %arg5: memref<24x256xf32, #tpu.memory_space<vmem>>, %arg6: memref<1x256xf32, #tpu.memory_space<vmem>>, %arg7: memref<128x128xf32, #tpu.memory_space<vmem>>, %arg8: memref<1x128xf32, #tpu.memory_space<vmem>>, %arg9: memref<64x128xf32, #tpu.memory_space<vmem>>, %arg10: memref<64x64xf32, #tpu.memory_space<vmem>>, %arg11: memref<64x128xf32, #tpu.memory_space<vmem>>) attributes {dimension_semantics = [#tpu.dimension_semantics<parallel>], iteration_bounds = array<i64: 1>, scalar_prefetch = 0 : i64, scratch_operands = 0 : i64, tpu.core_type = #tpu.core_type<tc>, window_params = [{transform_indices = @transform_0, window_bounds = array<i64: 64, 32>}, {transform_indices = @transform_1, window_bounds = array<i64: 128, 24>}, {pipeline_mode = #tpu.pipeline_mode<synchronous>, transform_indices = @transform_2, window_bounds = array<i64: 32, 128>}, {pipeline_mode = #tpu.pipeline_mode<synchronous>, transform_indices = @transform_3, window_bounds = array<i64: 1, 128>}, {pipeline_mode = #tpu.pipeline_mode<synchronous>, transform_indices = @transform_4, window_bounds = array<i64: 24, 256>}, {pipeline_mode = #tpu.pipeline_mode<synchronous>, transform_indices = @transform_5, window_bounds = array<i64: 1, 256>}, {pipeline_mode = #tpu.pipeline_mode<synchronous>, transform_indices = @transform_6, window_bounds = array<i64: 128, 128>}, {pipeline_mode = #tpu.pipeline_mode<synchronous>, transform_indices = @transform_7, window_bounds = array<i64: 1, 128>}, {pipeline_mode = #tpu.pipeline_mode<synchronous>, transform_indices = @transform_8, window_bounds = array<i64: 64, 128>}, {pipeline_mode = #tpu.pipeline_mode<synchronous>, transform_indices = @transform_9, window_bounds = array<i64: 64, 64>}, {transform_indices = @transform_10, window_bounds = array<i64: 64, 128>}]} {
    %c0 = arith.constant 0 : index
    %c0_0 = arith.constant 0 : index
    %0 = vector.load %arg1[%c0, %c0_0] : memref<64x32xf32, #tpu.memory_space<vmem>>, vector<64x32xf32>
    %c0_1 = arith.constant 0 : index
    %c0_2 = arith.constant 0 : index
    %1 = vector.load %arg2[%c0_1, %c0_2] : memref<128x24xf32, #tpu.memory_space<vmem>>, vector<128x24xf32>
    %c0_3 = arith.constant 0 : index
    %c0_4 = arith.constant 0 : index
    %2 = vector.load %arg3[%c0_3, %c0_4] : memref<32x128xf32, #tpu.memory_space<vmem>>, vector<32x128xf32>
    %cst = arith.constant dense<0.000000e+00> : vector<64x128xf32>
    %3 = tpu.matmul %0, %2, %cst {dimension_numbers = #tpu.dot_dimension_numbers<[1], [0], [0], [1], [0, 0, 1, 1], [], []>} : vector<64x32xf32>, vector<32x128xf32>, vector<64x128xf32> -> vector<64x128xf32>
    %c0_5 = arith.constant 0 : index
    %c0_6 = arith.constant 0 : index
    %4 = vector.load %arg4[%c0_5, %c0_6] : memref<1x128xf32, #tpu.memory_space<vmem>>, vector<1x128xf32>
    %5 = vector.broadcast %4 : vector<1x128xf32> to vector<64x128xf32>
    %6 = arith.addf %3, %5 : vector<64x128xf32>
    %c0_7 = arith.constant 0 : index
    %c0_8 = arith.constant 0 : index
    %7 = vector.load %arg5[%c0_7, %c0_8] : memref<24x256xf32, #tpu.memory_space<vmem>>, vector<24x256xf32>
    %cst_9 = arith.constant dense<0.000000e+00> : vector<128x256xf32>
    %8 = tpu.matmul %1, %7, %cst_9 {dimension_numbers = #tpu.dot_dimension_numbers<[1], [0], [0], [1], [0, 0, 1, 1], [], []>} : vector<128x24xf32>, vector<24x256xf32>, vector<128x256xf32> -> vector<128x256xf32>
    %c0_10 = arith.constant 0 : index
    %c0_11 = arith.constant 0 : index
    %9 = vector.load %arg6[%c0_10, %c0_11] : memref<1x256xf32, #tpu.memory_space<vmem>>, vector<1x256xf32>
    %10 = vector.broadcast %9 : vector<1x256xf32> to vector<128x256xf32>
    %11 = arith.addf %8, %10 : vector<128x256xf32>
    %12 = vector.extract_strided_slice %11 {offsets = [0, 0], sizes = [128, 128], strides = [1, 1]} : vector<128x256xf32> to vector<128x128xf32>
    %13 = vector.extract_strided_slice %11 {offsets = [0, 128], sizes = [128, 128], strides = [1, 1]} : vector<128x256xf32> to vector<128x128xf32>
    %14 = vector.shape_cast %6 : vector<64x128xf32> to vector<8x8x128xf32>
    %15 = vector.shape_cast %12 : vector<128x128xf32> to vector<8x16x128xf32>
    %16 = vector.shape_cast %13 : vector<128x128xf32> to vector<8x16x128xf32>
    %c0_12 = arith.constant 0 : index
    %c0_13 = arith.constant 0 : index
    %17 = vector.load %arg9[%c0_12, %c0_13] : memref<64x128xf32, #tpu.memory_space<vmem>>, vector<64x128xf32>
    %18 = tpu.concatenate %15, %15, %15, %15 in 1 : vector<8x16x128xf32>, vector<8x16x128xf32>, vector<8x16x128xf32>, vector<8x16x128xf32> -> vector<8x64x128xf32>
    %19 = vector.shape_cast %17 : vector<64x128xf32> to vector<1x64x128xf32>
    %20 = vector.broadcast %19 : vector<1x64x128xf32> to vector<8x64x128xf32>
    %21 = arith.mulf %18, %20 : vector<8x64x128xf32>
    %22 = tpu.concatenate %16, %16, %16, %16 in 1 : vector<8x16x128xf32>, vector<8x16x128xf32>, vector<8x16x128xf32>, vector<8x16x128xf32> -> vector<8x64x128xf32>
    %23 = vector.shape_cast %17 : vector<64x128xf32> to vector<1x64x128xf32>
    %24 = vector.broadcast %23 : vector<1x64x128xf32> to vector<8x64x128xf32>
    %25 = arith.mulf %22, %24 : vector<8x64x128xf32>
    "tpu.trace_start"() <{level = 10 : i32, message = "bqc,bjc->bqj"}> : () -> ()
    %cst_14 = arith.constant dense<0.000000e+00> : vector<8x8x64xf32>
    %26 = tpu.matmul %14, %21, %cst_14 {dimension_numbers = #tpu.dot_dimension_numbers<[2], [2], [1], [1], [0, 0, 0, 1, 1, 1], [0], [0]>} : vector<8x8x128xf32>, vector<8x64x128xf32>, vector<8x8x64xf32> -> vector<8x8x64xf32>
    "tpu.trace_stop"() : () -> ()
    %cst_15 = arith.constant 0.0883883461 : f32
    %27 = vector.broadcast %cst_15 : f32 to vector<8x8x64xf32>
    %28 = arith.mulf %26, %27 : vector<8x8x64xf32>
    %29 = vector.shape_cast %28 : vector<8x8x64xf32> to vector<64x64xf32>
    %cst_16 = arith.constant dense<0xFF800000> : vector<64xf32>
    %30 = vector.multi_reduction <maximumf>, %29, %cst_16 [1] : vector<64x64xf32> to vector<64xf32>
    %31 = vector.shape_cast %30 : vector<64xf32> to vector<64x1xf32>
    %32 = vector.broadcast %31 : vector<64x1xf32> to vector<64x64xf32>
    %33 = arith.subf %29, %32 : vector<64x64xf32>
    %34 = math.exp %33 : vector<64x64xf32>
    %c0_17 = arith.constant 0 : index
    %c0_18 = arith.constant 0 : index
    %35 = vector.load %arg10[%c0_17, %c0_18] : memref<64x64xf32, #tpu.memory_space<vmem>>, vector<64x64xf32>
    %cst_19 = arith.constant dense<0.000000e+00> : vector<64x64xf32>
    %36 = tpu.matmul %34, %35, %cst_19 {dimension_numbers = #tpu.dot_dimension_numbers<[1], [0], [0], [1], [0, 0, 1, 1], [], []>} : vector<64x64xf32>, vector<64x64xf32>, vector<64x64xf32> -> vector<64x64xf32>
    %37 = tpu.reciprocal %36 {approx = true} : vector<64x64xf32> -> vector<64x64xf32>
    %38 = arith.mulf %34, %37 : vector<64x64xf32>
    %39 = vector.shape_cast %38 : vector<64x64xf32> to vector<8x8x64xf32>
    "tpu.trace_start"() <{level = 10 : i32, message = "bqj,bjc->bqc"}> : () -> ()
    %cst_20 = arith.constant dense<0.000000e+00> : vector<8x8x128xf32>
    %40 = tpu.matmul %39, %25, %cst_20 {dimension_numbers = #tpu.dot_dimension_numbers<[2], [1], [1], [2], [0, 0, 0, 1, 1, 2], [0], [0]>} : vector<8x8x64xf32>, vector<8x64x128xf32>, vector<8x8x128xf32> -> vector<8x8x128xf32>
    "tpu.trace_stop"() : () -> ()
    %41 = arith.addf %14, %40 : vector<8x8x128xf32>
    %42 = vector.shape_cast %41 : vector<8x8x128xf32> to vector<64x128xf32>
    %c0_21 = arith.constant 0 : index
    %c0_22 = arith.constant 0 : index
    %43 = vector.load %arg7[%c0_21, %c0_22] : memref<128x128xf32, #tpu.memory_space<vmem>>, vector<128x128xf32>
    %cst_23 = arith.constant dense<0.000000e+00> : vector<64x128xf32>
    %44 = tpu.matmul %42, %43, %cst_23 {dimension_numbers = #tpu.dot_dimension_numbers<[1], [0], [0], [1], [0, 0, 1, 1], [], []>} : vector<64x128xf32>, vector<128x128xf32>, vector<64x128xf32> -> vector<64x128xf32>
    %c0_24 = arith.constant 0 : index
    %c0_25 = arith.constant 0 : index
    %45 = vector.load %arg8[%c0_24, %c0_25] : memref<1x128xf32, #tpu.memory_space<vmem>>, vector<1x128xf32>
    %46 = vector.broadcast %45 : vector<1x128xf32> to vector<64x128xf32>
    %47 = arith.addf %44, %46 : vector<64x128xf32>
    %cst_26 = arith.constant 0.000000e+00 : f32
    %48 = vector.broadcast %cst_26 : f32 to vector<64x128xf32>
    %49 = arith.maximumf %47, %48 : vector<64x128xf32>
    %50 = arith.addf %42, %49 : vector<64x128xf32>
    %c0_27 = arith.constant 0 : index
    %c0_28 = arith.constant 0 : index
    %51 = vector.load %arg11[%c0_27, %c0_28] : memref<64x128xf32, #tpu.memory_space<vmem>>, vector<64x128xf32>
    tpu.vector_store %arg11[%c0_27, %c0_28], %50 {strides = array<i32>} : memref<64x128xf32, #tpu.memory_space<vmem>>, vector<64x128xf32>,
    return
  }
  func.func @transform_0(%arg0: i32) -> (i32, i32) {
    %c0_i32 = arith.constant 0 : i32
    %c0_i32_0 = arith.constant 0 : i32
    return %arg0, %c0_i32 : i32, i32
  }
  func.func @transform_1(%arg0: i32) -> (i32, i32) {
    %c0_i32 = arith.constant 0 : i32
    %c0_i32_0 = arith.constant 0 : i32
    return %arg0, %c0_i32 : i32, i32
  }
  func.func @transform_2(%arg0: i32) -> (i32, i32) {
    %c0_i32 = arith.constant 0 : i32
    %c0_i32_0 = arith.constant 0 : i32
    %c0_i32_1 = arith.constant 0 : i32
    return %c0_i32, %c0_i32_0 : i32, i32
  }
  func.func @transform_3(%arg0: i32) -> (i32, i32) {
    %c0_i32 = arith.constant 0 : i32
    %c0_i32_0 = arith.constant 0 : i32
    %c0_i32_1 = arith.constant 0 : i32
    return %c0_i32, %c0_i32_0 : i32, i32
  }
  func.func @transform_4(%arg0: i32) -> (i32, i32) {
    %c0_i32 = arith.constant 0 : i32
    %c0_i32_0 = arith.constant 0 : i32
    %c0_i32_1 = arith.constant 0 : i32
    return %c0_i32, %c0_i32_0 : i32, i32
  }
  func.func @transform_5(%arg0: i32) -> (i32, i32) {
    %c0_i32 = arith.constant 0 : i32
    %c0_i32_0 = arith.constant 0 : i32
    %c0_i32_1 = arith.constant 0 : i32
    return %c0_i32, %c0_i32_0 : i32, i32
  }
  func.func @transform_6(%arg0: i32) -> (i32, i32) {
    %c0_i32 = arith.constant 0 : i32
    %c0_i32_0 = arith.constant 0 : i32
    %c0_i32_1 = arith.constant 0 : i32
    return %c0_i32, %c0_i32_0 : i32, i32
  }
  func.func @transform_7(%arg0: i32) -> (i32, i32) {
    %c0_i32 = arith.constant 0 : i32
    %c0_i32_0 = arith.constant 0 : i32
    %c0_i32_1 = arith.constant 0 : i32
    return %c0_i32, %c0_i32_0 : i32, i32
  }
  func.func @transform_8(%arg0: i32) -> (i32, i32) {
    %c0_i32 = arith.constant 0 : i32
    %c0_i32_0 = arith.constant 0 : i32
    %c0_i32_1 = arith.constant 0 : i32
    return %c0_i32, %c0_i32_0 : i32, i32
  }
  func.func @transform_9(%arg0: i32) -> (i32, i32) {
    %c0_i32 = arith.constant 0 : i32
    %c0_i32_0 = arith.constant 0 : i32
    %c0_i32_1 = arith.constant 0 : i32
    return %c0_i32, %c0_i32_0 : i32, i32
  }
  func.func @transform_10(%arg0: i32) -> (i32, i32) {
    %c0_i32 = arith.constant 0 : i32
    %c0_i32_0 = arith.constant 0 : i32
    return %arg0, %c0_i32 : i32, i32
  }
}

</mosaic_0001>

<bundles_post_ra>
// kernel: tpu_custom_call.1
= control target key start
LH: loop header
LB: loop body
LE: loop exit
PB: predicated region body
PF: predicated region fallthrough
CT: control target
= control target key end

     0   :  { %15 = vsyncpa [#allocation3], 0  ;;  %s4345_s0 = inlined_call_operand.vmem [shape: f32[64,32], index: 0, kind: input, shape index: {}]   ;;  %s4346_s1 = inlined_call_operand.vmem [shape: f32[128,24], index: 1, kind: input, shape index: {}]   ;;  %s4347_s2 = inlined_call_operand.hbm [shape: f32[32,128], index: 2, kind: input, shape index: {}]   ;;  %s4348_s3 = inlined_call_operand.vmem [shape: f32[1,128], index: 3, kind: input, shape index: {}]   ;;  %s4349_s4 = inlined_call_operand.hbm [shape: f32[24,256], index: 4, kind: input, shape index: {}]   ;;  %s4350_s5 = inlined_call_operand.vmem [shape: f32[1,256], index: 5, kind: input, shape index: {}]   ;;  %s4351_s6 = inlined_call_operand.vmem [shape: f32[128,128], index: 6, kind: input, shape index: {}]   ;;  %s4352_s7 = inlined_call_operand.vmem [shape: f32[1,128], index: 7, kind: input, shape index: {}]   ;;  %s4353_s8 = inlined_call_operand.vmem [shape: f32[64,128], index: 8, kind: input, shape index: {}]   ;;  %s4354_s9 = inlined_call_operand.vmem [shape: f32[64,64], index: 9, kind: input, shape index: {}]   ;;  %s4355_s10 = inlined_call_operand.hbm [shape: f32[64,128], index: 10, kind: output, shape index: {}]  }
   0x1   :  { %16 = vsyncpa [#allocation6], 0 }
   0x2   :  { %17 = vsyncpa [#allocation4], 0  ;;  %s3125_s13 = smov [#allocation2]   ;;  %s3053_s17 = scalar_lea.hbm %s4347_s2, 512 }
   0x3   :  { %s27_s14 = sshll.u32 %s3125_s13, 4  ;;  %p3054_p0 = scmp.ne.s32.totalorder %s4347_s2, %s3053_s17  ;;  %s28_s14 = int_to_ptr.vmem [resolvable:$true] %s27_s14 }
   0x4   :  { %p3057_p1 = scmp.lt.u32.totalorder %s3053_s17, %s4347_s2 }
   0x6   :  { %p3059_p2 = pnand %p3057_p1, %p3054_p0 }
   0x8   :  { %3062 = shalt.err (!%p3059_p2)
}
   0x9   :  { %s3063_s22 = scalar_lea.vmem %s28_s14, 512  ;;  %p3068_p4 = scmp.lt.s32.totalorder %s28_s14, %s28_s14 }
   0xa   :  { %p3064_p3 = scmp.ne.s32.totalorder %s28_s14, %s3063_s22  ;;  %p3069_p5 = scmp.lt.s32.totalorder %s3063_s22, %s3063_s22 }
   0xc   :  { %p3070_p6 = por %p3069_p5, %p3068_p4 }
   0xe   :  { %p3071_p7 = pnand %p3070_p6, %p3064_p3 }
  0x10   :  { %3074 = shalt.err (!%p3071_p7)
}
  0x11   :  { %s3126_s23 = smov 128   ;;  %s3127_s24 = smov 8  }
  0x12   :  { %33 = dma.hbm_to_vmem [thread:$0]  %s4347_s2, 512, %s28_s14, [#allocation3], %s3126_s23, %s3126_s23, %s3127_s24  }
  0x13   :  { %s3128_s27 = smov [#allocation5]   ;;  %s3075_s11 = scalar_lea.hbm %s4349_s4, 768 }
  0x14   :  { %s41_s28 = sshll.u32 %s3128_s27, 4  ;;  %p3076_p8 = scmp.ne.s32.totalorder %s4349_s4, %s3075_s11  ;;  %s42_s28 = int_to_ptr.vmem [resolvable:$true] %s41_s28 }
  0x15   :  { %p3079_p9 = scmp.lt.u32.totalorder %s3075_s11, %s4349_s4 }
  0x17   :  { %p3081_p10 = pnand %p3079_p9, %p3076_p8 }
  0x19   :  { %3084 = shalt.err (!%p3081_p10)
}
  0x1a   :  { %s3085_s17 = scalar_lea.vmem %s42_s28, 768  ;;  %p3090_p12 = scmp.lt.s32.totalorder %s42_s28, %s42_s28 }
  0x1b   :  { %p3086_p11 = scmp.ne.s32.totalorder %s42_s28, %s3085_s17  ;;  %p3091_p13 = scmp.lt.s32.totalorder %s3085_s17, %s3085_s17 }
  0x1d   :  { %p3092_p0 = por %p3091_p13, %p3090_p12 }
  0x1f   :  { %p3093_p1 = pnand %p3092_p0, %p3086_p11 }
  0x21   :  { %3096 = shalt.err (!%p3093_p1)
}
  0x22   :  { %s3129_s2 = smov 256   ;;  %s3130_s14 = smov 16  }
  0x23   :  { %47 = dma.hbm_to_vmem [thread:$0]  %s4349_s4, 768, %s42_s28, [#allocation6], %s3129_s2, %s3129_s2, %s3130_s14  }
  0x24   :  { %3119 = dma.done.wait [#allocation3], 512  }
  0x25   :  { %3120 = vsyncadd [#allocation3], 4294966784 }
  0x26   :  { %3121 = dma.done.wait [#allocation6], 768  }
  0x27   :  { %3122 = vsyncadd [#allocation6], 4294966528  ;;  %v4356_v0 = vmov 0.0   ;;  %v230_v1 = vld [vmem:[#allocation5 + $0x8] sm:$0xff]  ;;  %v232_v2 = vld [vmem:[#allocation5 + $0x18] sm:$0xff]  ;;  %vm99_vm0 = vcmask 261120   ;;  %v237_v40 = vlaneseq }
  0x28   :  { %360 = vmatprep.mubr.f32.mxu1 %v4356_v0  ;;  %v229_v3 = vld [vmem:[#allocation5] sm:$0xff]  ;;  %v2767_v4 = vpack.c.bf16 %v232_v2, %v230_v1  ;;  %v231_v5 = vld [vmem:[#allocation5 + $0x10] sm:$0xff]  ;;  %v234_v7 = vld [vmem:[#allocation5 + $0x28] sm:$0xff]  ;;  %vm247_vm1 = vcmask 195584   ;;  %v4358_v39 = vmov 0.0|0.0   ;;  %vm3133_vm2 = vmmov 0  }
  0x29   :  { %v2769_v6 = vpack.c.bf16 %v231_v5, %v229_v3  ;;  %v88_v8 = vld [vmem:[#allocation2] sm:$0xff]  ;;  %v89_v9 = vld [vmem:[#allocation2 + $0x8] sm:$0xff]  ;;  %v90_v11 = vld [vmem:[#allocation2 + $0x10] sm:$0xff]  ;;  %v238_v41 = vshrl.u32 %v237_v40, 7  ;;  %vm1161_vm3 = vcmask 523264  }
  0x2a   :  { %2768 = vmatprep.subr.bf16.mxu1 %v2767_v4  ;;  %v2759_v10 = vpack.c.bf16 %v89_v9, %v88_v8  ;;  %v91_v12 = vld [vmem:[#allocation2 + $0x18] sm:$0xff]  ;;  %v233_v13 = vld [vmem:[#allocation5 + $0x20] sm:$0xff]  ;;  %v73_v17 = vld [vmem:[%s4346_s1 + $0x8] sm:$0xff] }
  0x2b   :  { %2770 = vmatpush1.bf16.msra.mxu1 %v2769_v6  ;;  %v2763_v14 = vpack.c.bf16 %v91_v12, %v90_v11  ;;  %v64_v15 = vld [vmem:[%s4345_s0] sm:$0xff]  ;;  %v65_v18 = vld [vmem:[%s4345_s0 + $0x8] sm:$0xff]  ;;  %v66_v19 = vld [vmem:[%s4345_s0 + $0x10] sm:$0xff]  ;;  %v239_v42 = vsub.s32 0, %v238_v41  ;;  %v243_v44 = vsub.s32 1, %v238_v41 }
  0x2c   :  { %300 = vmatprep.subr.mxu1 %v234_v7  ;;  %v72_v16 = vld [vmem:[%s4346_s1] sm:$0xff]  ;;  %2760 = vmatprep.subr.bf16.mxu0 %v2759_v10  ;;  %v74_v20 = vld [vmem:[%s4346_s1 + $0x10] sm:$0xff]  ;;  %v67_v21 = vld [vmem:[%s4345_s0 + $0x18] sm:$0xff] }
  0x2d   :  { %2371 = vmatprep.mubr.msk.f32.mxu0 %vm99_vm0, %v64_v15  ;;  %2762 = vmatpush3.bf16.msra.mxu0 %v2759_v10  ;;  %v68_v22 = vld [vmem:[%s4345_s0 + $0x20] sm:$0xff]  ;;  %v75_v23 = vld [vmem:[%s4346_s1 + $0x18] sm:$0xff]  ;;  %v69_v24 = vld [vmem:[%s4345_s0 + $0x28] sm:$0xff] }
  0x2e   :  { %2764 = vmatprep.subr.bf16.mxu0 %v2763_v14  ;;  %v70_v25 = vld [vmem:[%s4345_s0 + $0x30] sm:$0xff]  ;;  %v76_v26 = vld [vmem:[%s4346_s1 + $0x20] sm:$0xff]  ;;  %v71_v27 = vld [vmem:[%s4345_s0 + $0x38] sm:$0xff] }
  0x2f   :  { %301 = vmatpush1.msra.mxu1 %v233_v13  ;;  %v77_v28 = vld [vmem:[%s4346_s1 + $0x28] sm:$0xff]  ;;  %v78_v29 = vld [vmem:[%s4346_s1 + $0x30] sm:$0xff]  ;;  %v79_v30 = vld [vmem:[%s4346_s1 + $0x38] sm:$0xff] }
  0x30   :  { %2134 = vmatmul.mubr.msk.f32.vlgmr.msra.gmra.mrb[0].mxu1 %vm247_vm1, %v72_v16  ;;  %v80_v31 = vld [vmem:[%s4346_s1 + $0x40] sm:$0xff]  ;;  %v81_v32 = vld [vmem:[%s4346_s1 + $0x48] sm:$0xff]  ;;  %v82_v33 = vld [vmem:[%s4346_s1 + $0x50] sm:$0xff]  ;;  %2783 = vmatprep.subr.bf16.mxu1 %v4358_v39 }
  0x31   :  { %366 = vmatprep.mubr.f32.mxu1 %v4356_v0  ;;  %2766 = vmatpush3.bf16.msra.mxu0 %v2763_v14  ;;  %v83_v34 = vld [vmem:[%s4346_s1 + $0x58] sm:$0xff]  ;;  %v84_v35 = vld [vmem:[%s4346_s1 + $0x60] sm:$0xff]  ;;  %v85_v36 = vld [vmem:[%s4346_s1 + $0x68] sm:$0xff] }
  0x32   :  { %v86_v37 = vld [vmem:[%s4346_s1 + $0x70] sm:$0xff]  ;;  %v87_v38 = vld [vmem:[%s4346_s1 + $0x78] sm:$0xff]  ;;  %2771 = vmatprep.subr.bf16.mxu0 %v4358_v39  ;;  %v235_v43 = vld [vmem:[%s4350_s5] sm:$0x3] }
  0x33   :  { %v3338_v45 = vrot.slane %v235_v43, %v239_v42  ;;  %v3340_v46 = vrot.slane %v235_v43, %v243_v44  ;;  %v3345_v48 = vld [vmem:[%s4353_s8] sm:$0xff]  ;;  %v3351_v50 = vld [vmem:[%s4353_s8 + $0x10] sm:$0xff]  ;;  %v3367_v55 = vld [vmem:[%s4353_s8 + $0x8] sm:$0xff] }
  0x34   :  { %2135 = vmatmul.mubr.msk.f32.gmra.mrb[2].mxu1 %vm247_vm1, %v73_v17  ;;  %2372 = vmatmul.mubr.msk.f32.vlgmr.msra.gmra.mrb[0].mxu0 %vm99_vm0, %v65_v18  ;;  %v3356_v51 = vld [vmem:[%s4353_s8 + $0x20] sm:$0xff]  ;;  %v3361_v52 = vld [vmem:[%s4353_s8 + $0x30] sm:$0xff]  ;;  %v3384_v61 = vld [vmem:[%s4353_s8 + $0x18] sm:$0xff] }
  0x35   :  { %372 = vmatprep.mubr.f32.mxu1 %v4356_v0  ;;  %2374 = vmatprep.mubr.msk.f32.mxu0 %vm99_vm0, %v66_v19  ;;  %v3389_v62 = vld [vmem:[%s4353_s8 + $0x28] sm:$0xff]  ;;  %v3394_v63 = vld [vmem:[%s4353_s8 + $0x38] sm:$0xff]  ;;  %v3470_v40 = vld [vmem:[%s4348_s3] ss:$0 sm:$0xff] }
  0x38   :  { %2136 = vmatmul.mubr.msk.f32.gmra.mrb[4].mxu1 %vm247_vm1, %v74_v20  ;;  %2375 = vmatmul.mubr.msk.f32.gmra.mrb[2].mxu0 %vm99_vm0, %v67_v21 }
  0x39   :  { %378 = vmatprep.mubr.f32.mxu1 %v4356_v0  ;;  %2377 = vmatprep.mubr.msk.f32.mxu0 %vm99_vm0, %v68_v22 }
  0x3c   :  { %2137 = vmatmul.mubr.msk.f32.gmra.mrb[6].mxu1 %vm247_vm1, %v75_v23  ;;  %2378 = vmatmul.mubr.msk.f32.gmra.mrb[4].mxu0 %vm99_vm0, %v69_v24 }
  0x3d   :  { %384 = vmatprep.mubr.f32.mxu1 %v4356_v0  ;;  %2380 = vmatprep.mubr.msk.f32.mxu0 %vm99_vm0, %v70_v25 }
  0x40   :  { %2138 = vmatmul.mubr.msk.f32.gmra.mrb[8].mxu1 %vm247_vm1, %v76_v26  ;;  %2381 = vmatmul.mubr.msk.f32.gmra.mrb[6].mxu0 %vm99_vm0, %v71_v27 }
  0x41   :  { %390 = vmatprep.mubr.f32.mxu1 %v4356_v0  ;;  %2399 = vmatprep.mubr.msk.f32.mxu0 %vm3133_vm2, %v4356_v0 }
  0x44   :  { %2139 = vmatmul.mubr.msk.f32.gmra.mrb[10].mxu1 %vm247_vm1, %v77_v28 }
  0x45   :  { %396 = vmatprep.mubr.f32.mxu1 %v4356_v0 }
  0x48   :  { %2140 = vmatmul.mubr.msk.f32.gmra.mrb[12].mxu1 %vm247_vm1, %v78_v29 }
  0x49   :  { %402 = vmatprep.mubr.f32.mxu1 %v4356_v0 }
  0x4c   :  { %2141 = vmatmul.mubr.msk.f32.gmra.mrb[14].mxu1 %vm247_vm1, %v79_v30 }
  0x4d   :  { %408 = vmatprep.mubr.f32.mxu1 %v4356_v0 }
  0x50   :  { %2142 = vmatmul.mubr.msk.f32.gmra.mrb[16].mxu1 %vm247_vm1, %v80_v31 }
  0x51   :  { %414 = vmatprep.mubr.f32.mxu1 %v4356_v0 }
  0x54   :  { %2143 = vmatmul.mubr.msk.f32.gmra.mrb[18].mxu1 %vm247_vm1, %v81_v32 }
  0x55   :  { %420 = vmatprep.mubr.f32.mxu1 %v4356_v0 }
  0x58   :  { %2144 = vmatmul.mubr.msk.f32.gmra.mrb[20].mxu1 %vm247_vm1, %v82_v33 }
  0x59   :  { %426 = vmatprep.mubr.f32.mxu1 %v4356_v0 }
  0x5c   :  { %2145 = vmatmul.mubr.msk.f32.gmra.mrb[22].mxu1 %vm247_vm1, %v83_v34 }
  0x5d   :  { %432 = vmatprep.mubr.f32.mxu1 %v4356_v0 }
  0x60   :  { %2146 = vmatmul.mubr.msk.f32.gmra.mrb[24].mxu1 %vm247_vm1, %v84_v35 }
  0x61   :  { %438 = vmatprep.mubr.f32.mxu1 %v4356_v0 }
  0x64   :  { %2147 = vmatmul.mubr.msk.f32.gmra.mrb[26].mxu1 %vm247_vm1, %v85_v36 }
  0x65   :  { %444 = vmatprep.mubr.f32.mxu1 %v4356_v0 }
  0x68   :  { %2148 = vmatmul.mubr.msk.f32.gmra.mrb[28].mxu1 %vm247_vm1, %v86_v37 }
  0x69   :  { %450 = vmatprep.mubr.f32.mxu1 %v4356_v0 }
  0x6c   :  { %2149 = vmatmul.mubr.msk.f32.gmra.mrb[30].mxu1 %vm247_vm1, %v87_v38 }
  0x6d   :  { %2418 = vmatprep.mubr.msk.f32.mxu1 %vm3133_vm2, %v4356_v0 }
 0x103   :  { %v362_v47 = vpop.f32.mrb[0].mxu1 }
 0x104   :  { %v363_v49 = vadd.f32 %v362_v47, %v3338_v45  ;;  %v364_v53 = vpop.f32.mrb[1].mxu1 }
 0x105   :  { %v365_v54 = vadd.f32 %v364_v53, %v3340_v46 }
 0x106   :  { %v465_v1 = vmul.f32 %v3345_v48, %v363_v49  ;;  %v3401_v5 = vmul.f32 %v3351_v50, %v363_v49  ;;  %v3404_v6 = vmul.f32 %v3356_v51, %v363_v49  ;;  %v3407_v7 = vmul.f32 %v3361_v52, %v363_v49 }
 0x107   :  { %v3370_v56 = vmul.f32 %v3345_v48, %v365_v54  ;;  %v3373_v57 = vmul.f32 %v3351_v50, %v365_v54  ;;  %v3376_v58 = vmul.f32 %v3356_v51, %v365_v54  ;;  %v3379_v59 = vmul.f32 %v3361_v52, %v365_v54  ;;  %v368_v60 = vpop.f32.mrb[2].mxu1  ;;  %v3398_v4 = vpop.f32.mrb[0].mxu0 }
 0x108   :  { %v369_v2 = vadd.f32 %v368_v60, %v3338_v45  ;;  %v370_v3 = vpop.f32.mrb[3].mxu1  ;;  %v3410_v9 = vpop.f32.mrb[1].mxu0 }
 0x109   :  { %4418 = vst [vmem:[#allocation11_spill] sm:$0xff] %v3370_v56  ;;  %4419 = vst [vmem:[#allocation12_spill] sm:$0xff] %v3373_v57  ;;  %v371_v8 = vadd.f32 %v370_v3, %v3340_v46 }
 0x10a   :  { %4420 = vst [vmem:[#allocation13_spill] sm:$0xff] %v3376_v58  ;;  %4421 = vst [vmem:[#allocation14_spill] sm:$0xff] %v3379_v59  ;;  %v466_v10 = vmul.f32 %v3367_v55, %v369_v2  ;;  %v468_v11 = vmul.f32 %v3384_v61, %v369_v2  ;;  %v3415_v12 = vmul.f32 %v3389_v62, %v369_v2 }
 0x10b   :  { %v3418_v13 = vmul.f32 %v3394_v63, %v369_v2  ;;  %v3421_v14 = vmul.f32 %v3367_v55, %v371_v8  ;;  %v3424_v15 = vmul.f32 %v3384_v61, %v371_v8  ;;  %v3427_v16 = vmul.f32 %v3389_v62, %v371_v8  ;;  %v374_v18 = vpop.f32.mrb[4].mxu1  ;;  %v3436_v24 = vpop.f32.mrb[2].mxu0 }
 0x10c   :  { %v3430_v17 = vmul.f32 %v3394_v63, %v371_v8  ;;  %v375_v19 = vadd.f32 %v374_v18, %v3338_v45  ;;  %v376_v20 = vpop.f32.mrb[5].mxu1  ;;  %v2772_v21 = vpack.c.bf16 %v466_v10, %v465_v1  ;;  %v2775_v22 = vpack.c.bf16 %v468_v11, %v3401_v5  ;;  %v3441_v27 = vpop.f32.mrb[3].mxu0 }
 0x10d   :  { %4422 = vst [vmem:[#allocation15_spill] sm:$0xff] %v3421_v14  ;;  %4423 = vst [vmem:[#allocation16_spill] sm:$0xff] %v3424_v15  ;;  %v377_v25 = vadd.f32 %v376_v20, %v3340_v46 }
 0x10e   :  { %4424 = vst [vmem:[#allocation17_spill] sm:$0xff] %v3427_v16  ;;  %4425 = vst [vmem:[#allocation18_spill] sm:$0xff] %v3430_v17  ;;  %v473_v28 = vmul.f32 %v3345_v48, %v375_v19  ;;  %v3445_v29 = vmul.f32 %v3351_v50, %v375_v19  ;;  %v3448_v30 = vmul.f32 %v3356_v51, %v375_v19  ;;  %2773 = vmatpush3.bf16.xpose.msra.mxu0 %v2772_v21 }
 0x10f   :  { %v3451_v31 = vmul.f32 %v3345_v48, %v377_v25  ;;  %v3454_v32 = vmul.f32 %v3351_v50, %v377_v25  ;;  %v3457_v33 = vmul.f32 %v3356_v51, %v377_v25  ;;  %v3460_v34 = vmul.f32 %v3361_v52, %v377_v25  ;;  %v380_v35 = vpop.f32.mrb[6].mxu1  ;;  %2774 = vmatprep.subr.bf16.mxu0 %v4358_v39  ;;  %v2379_v41 = vpop.f32.mrb[4].mxu0 }
 0x110   :  { %v3464_v36 = vmul.f32 %v3361_v52, %v375_v19  ;;  %v381_v37 = vadd.f32 %v380_v35, %v3338_v45  ;;  %v382_v38 = vpop.f32.mrb[7].mxu1  ;;  %v3478_v47 = vadd.f32 %v2379_v41, %v3470_v40  ;;  %v210_v49 = vpop.f32.mrb[5].mxu0 }
 0x111   :  { %4426 = vst [vmem:[#allocation19_spill] sm:$0xff] %v3451_v31  ;;  %4427 = vst [vmem:[#allocation20_spill] sm:$0xff] %v3454_v32  ;;  %v383_v44 = vadd.f32 %v382_v38, %v3340_v46  ;;  %v3512_v54 = vadd.f32 %v3470_v40, %v210_v49 }
 0x112   :  { %4428 = vst [vmem:[#allocation21_spill] sm:$0xff] %v3457_v33  ;;  %4429 = vst [vmem:[#allocation22_spill] sm:$0xff] %v3460_v34  ;;  %v474_v60 = vmul.f32 %v3367_v55, %v381_v37  ;;  %v476_v1 = vmul.f32 %v3384_v61, %v381_v37  ;;  %v3487_v2 = vmul.f32 %v3389_v62, %v381_v37 }
 0x113   :  { %4430 = vst [vmem:[#allocation23_spill] sm:$0xff] %v3478_v47  ;;  %v3490_v3 = vmul.f32 %v3394_v63, %v381_v37  ;;  %v3493_v5 = vmul.f32 %v3367_v55, %v383_v44  ;;  %v3496_v8 = vmul.f32 %v3384_v61, %v383_v44  ;;  %v3499_v10 = vmul.f32 %v3389_v62, %v383_v44  ;;  %v386_v18 = vpop.f32.mrb[8].mxu1  ;;  %v2382_v37 = vpop.f32.mrb[6].mxu0 }
 0x114   :  { %v3502_v11 = vmul.f32 %v3394_v63, %v383_v44  ;;  %v2784_v19 = vpack.c.bf16 %v474_v60, %v473_v28  ;;  %v2787_v20 = vpack.c.bf16 %v476_v1, %v3445_v29  ;;  %v387_v21 = vadd.f32 %v386_v18, %v3338_v45  ;;  %v388_v25 = vpop.f32.mrb[9].mxu1  ;;  %4435 = vst [vmem:[#allocation28_spill] sm:$0xff] %v3512_v54  ;;  %v220_v28 = vpop.f32.mrb[7].mxu0 }
 0x115   :  { %4431 = vst [vmem:[#allocation24_spill] sm:$0xff] %v3493_v5  ;;  %4432 = vst [vmem:[#allocation25_spill] sm:$0xff] %v3496_v8  ;;  %v389_v38 = vadd.f32 %v388_v25, %v3340_v46  ;;  %v3515_v44 = vadd.f32 %v2382_v37, %v3470_v40  ;;  %v3545_v42 = vadd.f32 %v3470_v40, %v220_v28 }
 0x116   :  { %4433 = vst [vmem:[#allocation26_spill] sm:$0xff] %v3499_v10  ;;  %4434 = vst [vmem:[#allocation27_spill] sm:$0xff] %v3502_v11  ;;  %2776 = vmatpush3.bf16.xpose.msra.mxu0 %v2775_v22  ;;  %2785 = vmatpush3.bf16.xpose.msra.mxu1 %v2784_v19  ;;  %v3518_v29 = vmul.f32 %v3345_v48, %v387_v21  ;;  %v3521_v60 = vmul.f32 %v3351_v50, %v387_v21 }
 0x117   :  { %4436 = vst [vmem:[#allocation29_spill] sm:$0xff] %v3515_v44  ;;  %v3524_v1 = vmul.f32 %v3356_v51, %v387_v21  ;;  %2777 = vmatprep.subr.bf16.mxu0 %v4358_v39  ;;  %2786 = vmatprep.subr.bf16.mxu1 %v4358_v39  ;;  %v3529_v49 = vmul.f32 %v3361_v52, %v387_v21  ;;  %v392_v19 = vpop.f32.mrb[10].mxu1  ;;  %4441 = vst [vmem:[#allocation34_spill] sm:$0xff] %v3545_v42 }
 0x118   :  { %v3532_v18 = vmul.f32 %v3345_v48, %v389_v38  ;;  %v3535_v22 = vmul.f32 %v3351_v50, %v389_v38  ;;  %v3538_v25 = vmul.f32 %v3356_v51, %v389_v38  ;;  %v3541_v37 = vmul.f32 %v3361_v52, %v389_v38  ;;  %v394_v43 = vpop.f32.mrb[11].mxu1 }
 0x119   :  { %v393_v53 = vadd.f32 %v392_v19, %v3338_v45  ;;  %v395_v21 = vadd.f32 %v394_v43, %v3340_v46 }
 0x11a   :  { %4437 = vst [vmem:[#allocation30_spill] sm:$0xff] %v3532_v18  ;;  %4438 = vst [vmem:[#allocation31_spill] sm:$0xff] %v3535_v22 }
 0x11b   :  { %4439 = vst [vmem:[#allocation32_spill] sm:$0xff] %v3538_v25  ;;  %4440 = vst [vmem:[#allocation33_spill] sm:$0xff] %v3541_v37  ;;  %v3555_v38 = vmul.f32 %v3367_v55, %v393_v53  ;;  %v3558_v19 = vmul.f32 %v3384_v61, %v393_v53  ;;  %v3561_v28 = vmul.f32 %v3389_v62, %v393_v53  ;;  %v398_v39 = vpop.f32.mrb[12].mxu1 }
 0x11c   :  { %v3564_v43 = vmul.f32 %v3394_v63, %v393_v53  ;;  %v3567_v0 = vmul.f32 %v3367_v55, %v395_v21  ;;  %v3570_v41 = vmul.f32 %v3384_v61, %v395_v21  ;;  %v3573_v35 = vmul.f32 %v3389_v62, %v395_v21  ;;  %v400_v33 = vpop.f32.mrb[13].mxu1 }
 0x11d   :  { %v3576_v26 = vmul.f32 %v3394_v63, %v395_v21  ;;  %v399_v23 = vadd.f32 %v398_v39, %v3338_v45  ;;  %v401_v8 = vadd.f32 %v400_v33, %v3340_v46  ;;  %v4446_v53 = vpack.c.bf16 %v3415_v12, %v3404_v6 }
 0x11e   :  { %4442 = vst [vmem:[#allocation35_spill] sm:$0xff] %v3567_v0  ;;  %4443 = vst [vmem:[#allocation36_spill] sm:$0xff] %v3570_v41  ;;  %2788 = vmatpush3.bf16.xpose.msra.mxu1 %v2787_v20  ;;  %v4447_v33 = vmov 0.0|0.0   ;;  %v4468_v44 = vpack.c.bf16 %v3555_v38, %v3518_v29  ;;  %v4472_v38 = vmov 0.0  }
 0x11f   :  { %4444 = vst [vmem:[#allocation37_spill] sm:$0xff] %v3573_v35  ;;  %4445 = vst [vmem:[#allocation38_spill] sm:$0xff] %v3576_v26  ;;  %2779 = vmatpush3.bf16.xpose.msra.mxu0 %v4446_v53  ;;  %v3596_v10 = vmul.f32 %v3345_v48, %v399_v23  ;;  %v3599_v32 = vmul.f32 %v3351_v50, %v399_v23  ;;  %2789 = vmatprep.subr.bf16.mxu1 %v4447_v33  ;;  %v404_v12 = vpop.f32.mrb[14].mxu1 }
 0x120   :  { %2780 = vmatprep.subr.bf16.mxu0 %v4447_v33  ;;  %v3604_v21 = vmul.f32 %v3356_v51, %v399_v23  ;;  %v3607_v39 = vmul.f32 %v3345_v48, %v401_v8  ;;  %v3610_v6 = vmul.f32 %v3351_v50, %v401_v8  ;;  %v3613_v20 = vmul.f32 %v3356_v51, %v401_v8  ;;  %v406_v18 = vpop.f32.mrb[15].mxu1 }
 0x121   :  { %v3616_v53 = vmul.f32 %v3361_v52, %v401_v8  ;;  %v405_v31 = vadd.f32 %v404_v12, %v3338_v45  ;;  %v3622_v34 = vmul.f32 %v3361_v52, %v399_v23  ;;  %v407_v11 = vadd.f32 %v406_v18, %v3340_v46 }
 0x122   :  { %4448 = vst [vmem:[#allocation39_spill] sm:$0xff] %v3607_v39  ;;  %4449 = vst [vmem:[#allocation40_spill] sm:$0xff] %v3610_v6  ;;  %v3704_v6 = vadd.f32 %v3470_v40, %v3410_v9 }
 0x123   :  { %4450 = vst [vmem:[#allocation41_spill] sm:$0xff] %v3613_v20  ;;  %4451 = vst [vmem:[#allocation42_spill] sm:$0xff] %v3616_v53  ;;  %v3630_v8 = vmul.f32 %v3367_v55, %v405_v31  ;;  %v3633_v12 = vmul.f32 %v3384_v61, %v405_v31  ;;  %v3636_v17 = vmul.f32 %v3389_v62, %v405_v31  ;;  %v410_v37 = vpop.f32.mrb[16].mxu1 }
 0x124   :  { %v3639_v23 = vmul.f32 %v3394_v63, %v405_v31  ;;  %v3642_v18 = vmul.f32 %v3367_v55, %v407_v11  ;;  %v3645_v5 = vmul.f32 %v3384_v61, %v407_v11  ;;  %v3648_v59 = vmul.f32 %v3389_v62, %v407_v11  ;;  %v412_v35 = vpop.f32.mrb[17].mxu1  ;;  %4462 = vst [vmem:[#allocation51_spill] sm:$0xff] %v3704_v6 }
 0x125   :  { %v3651_v0 = vmul.f32 %v3394_v63, %v407_v11  ;;  %v411_v25 = vadd.f32 %v410_v37, %v3338_v45  ;;  %v413_v41 = vadd.f32 %v412_v35, %v3340_v46  ;;  %v4456_v31 = vpack.c.bf16 %v3418_v13, %v3407_v7 }
 0x126   :  { %4452 = vst [vmem:[#allocation43_spill] sm:$0xff] %v3642_v18  ;;  %4453 = vst [vmem:[#allocation44_spill] sm:$0xff] %v3645_v5  ;;  %v4457_v37 = vpack.c.bf16 %v3487_v2, %v3448_v30  ;;  %v4482_v14 = vpack.c.bf16 %v3630_v8, %v3596_v10 }
 0x127   :  { %4454 = vst [vmem:[#allocation45_spill] sm:$0xff] %v3648_v59  ;;  %4455 = vst [vmem:[#allocation46_spill] sm:$0xff] %v3651_v0  ;;  %2782 = vmatpush3.bf16.xpose.msra.mxu0 %v4456_v31  ;;  %v3674_v22 = vmul.f32 %v3345_v48, %v411_v25  ;;  %v3677_v35 = vmul.f32 %v3351_v50, %v411_v25  ;;  %v3680_v58 = vmul.f32 %v3356_v51, %v411_v25  ;;  %v416_v2 = vpop.f32.mrb[18].mxu1 }
 0x128   :  { %2791 = vmatpush3.bf16.xpose.msra.mxu1 %v4457_v37  ;;  %2795 = vmatprep.subr.bf16.mxu0 %v4447_v33  ;;  %v3685_v7 = vmul.f32 %v3361_v52, %v411_v25  ;;  %v3688_v13 = vmul.f32 %v3345_v48, %v413_v41  ;;  %v3691_v30 = vmul.f32 %v3351_v50, %v413_v41  ;;  %v418_v11 = vpop.f32.mrb[19].mxu1 }
 0x129   :  { %2792 = vmatprep.subr.bf16.mxu1 %v4447_v33  ;;  %v3694_v31 = vmul.f32 %v3356_v51, %v413_v41  ;;  %v3697_v37 = vmul.f32 %v3361_v52, %v413_v41  ;;  %v417_v26 = vadd.f32 %v416_v2, %v3338_v45  ;;  %v419_v5 = vadd.f32 %v418_v11, %v3340_v46 }
 0x12a   :  { %4458 = vst [vmem:[#allocation47_spill] sm:$0xff] %v3688_v13  ;;  %4459 = vst [vmem:[#allocation48_spill] sm:$0xff] %v3691_v30  ;;  %v3787_v30 = vadd.f32 %v3398_v4, %v3470_v40 }
 0x12b   :  { %4460 = vst [vmem:[#allocation49_spill] sm:$0xff] %v3694_v31  ;;  %4461 = vst [vmem:[#allocation50_spill] sm:$0xff] %v3697_v37  ;;  %v3710_v18 = vmul.f32 %v3367_v55, %v417_v26  ;;  %v3713_v41 = vmul.f32 %v3384_v61, %v417_v26  ;;  %v3716_v2 = vmul.f32 %v3389_v62, %v417_v26  ;;  %v422_v0 = vpop.f32.mrb[20].mxu1 }
 0x12c   :  { %v3719_v25 = vmul.f32 %v3394_v63, %v417_v26  ;;  %v3722_v9 = vmul.f32 %v3367_v55, %v419_v5  ;;  %v3725_v11 = vmul.f32 %v3384_v61, %v419_v5  ;;  %v3728_v39 = vmul.f32 %v3389_v62, %v419_v5  ;;  %v424_v59 = vpop.f32.mrb[21].mxu1  ;;  %4475 = vst [vmem:[#allocation61_spill] sm:$0xff] %v3787_v30 }
 0x12d   :  { %v3731_v53 = vmul.f32 %v3394_v63, %v419_v5  ;;  %v423_v20 = vadd.f32 %v422_v0, %v3338_v45  ;;  %v425_v57 = vadd.f32 %v424_v59, %v3340_v46  ;;  %v4467_v26 = vpack.c.bf16 %v3490_v3, %v3464_v36 }
 0x12e   :  { %4463 = vst [vmem:[#allocation52_spill] sm:$0xff] %v3722_v9  ;;  %4464 = vst [vmem:[#allocation53_spill] sm:$0xff] %v3725_v11  ;;  %2400 = vmatmul.mubr.f32.vlgmr.msra.gmra.mrb[8].mxu0 %v3704_v6 }
 0x12f   :  { %4465 = vst [vmem:[#allocation54_spill] sm:$0xff] %v3728_v39  ;;  %4466 = vst [vmem:[#allocation55_spill] sm:$0xff] %v3731_v53  ;;  %2797 = vmatpush3.bf16.xpose.msra.mxu0 %v4468_v44  ;;  %v3755_v16 = vmul.f32 %v3345_v48, %v423_v20  ;;  %v3758_v59 = vmul.f32 %v3351_v50, %v423_v20  ;;  %v3761_v5 = vmul.f32 %v3356_v51, %v423_v20  ;;  %v428_v29 = vpop.f32.mrb[22].mxu1 }
 0x130   :  { %2794 = vmatpush3.bf16.xpose.msra.mxu1 %v4467_v26  ;;  %2798 = vmatprep.subr.bf16.mxu0 %v4447_v33  ;;  %v3766_v36 = vmul.f32 %v3361_v52, %v423_v20  ;;  %v3769_v3 = vmul.f32 %v3345_v48, %v425_v57  ;;  %v3772_v44 = vmul.f32 %v3351_v50, %v425_v57  ;;  %v430_v20 = vpop.f32.mrb[23].mxu1 }
 0x131   :  { %2807 = vmatprep.subr.bf16.mxu1 %v4447_v33  ;;  %2437 = vmatprep.mubr.msk.f32.mxu0 %vm3133_vm2, %v4472_v38  ;;  %v3777_v26 = vmul.f32 %v3356_v51, %v425_v57  ;;  %v3780_v15 = vmul.f32 %v3361_v52, %v425_v57  ;;  %v429_v0 = vadd.f32 %v428_v29, %v3338_v45 }
 0x132   :  { %4469 = vst [vmem:[#allocation56_spill] sm:$0xff] %v3766_v36  ;;  %4470 = vst [vmem:[#allocation57_spill] sm:$0xff] %v3769_v3  ;;  %v431_v11 = vadd.f32 %v430_v20, %v3340_v46 }
 0x133   :  { %4471 = vst [vmem:[#allocation58_spill] sm:$0xff] %v3772_v44  ;;  %4473 = vst [vmem:[#allocation59_spill] sm:$0xff] %v3777_v26  ;;  %v3793_v9 = vmul.f32 %v3367_v55, %v429_v0  ;;  %v3796_v57 = vmul.f32 %v3384_v61, %v429_v0  ;;  %v3799_v29 = vmul.f32 %v3389_v62, %v429_v0  ;;  %v434_v53 = vpop.f32.mrb[24].mxu1 }
 0x134   :  { %4474 = vst [vmem:[#allocation60_spill] sm:$0xff] %v3780_v15  ;;  %v3802_v6 = vmul.f32 %v3394_v63, %v429_v0  ;;  %v3805_v4 = vmul.f32 %v3367_v55, %v431_v11  ;;  %v3808_v20 = vmul.f32 %v3384_v61, %v431_v11  ;;  %v3811_v13 = vmul.f32 %v3389_v62, %v431_v11  ;;  %v436_v56 = vpop.f32.mrb[25].mxu1 }
 0x135   :  { %v3814_v37 = vmul.f32 %v3394_v63, %v431_v11  ;;  %v435_v39 = vadd.f32 %v434_v53, %v3338_v45  ;;  %v437_v42 = vadd.f32 %v436_v56, %v3340_v46  ;;  %v4481_v53 = vpack.c.bf16 %v3558_v19, %v3521_v60 }
 0x136   :  { %4476 = vst [vmem:[#allocation62_spill] sm:$0xff] %v3802_v6  ;;  %4477 = vst [vmem:[#allocation63_spill] sm:$0xff] %v3805_v4 }
 0x137   :  { %4478 = vst [vmem:[#allocation64_spill] sm:$0xff] %v3808_v20  ;;  %4479 = vst [vmem:[#allocation65_spill] sm:$0xff] %v3811_v13  ;;  %2419 = vmatmul.mubr.f32.vlgmr.msra.gmra.mrb[32].mxu1 %v3787_v30  ;;  %2800 = vmatpush3.bf16.xpose.msra.mxu0 %v4481_v53  ;;  %v3838_v0 = vmul.f32 %v3345_v48, %v435_v39  ;;  %v3841_v56 = vmul.f32 %v3351_v50, %v435_v39  ;;  %v440_v10 = vpop.f32.mrb[26].mxu1 }
 0x138   :  { %4480 = vst [vmem:[#allocation66_spill] sm:$0xff] %v3814_v37  ;;  %2809 = vmatpush3.bf16.xpose.msra.mxu1 %v4482_v14  ;;  %v3844_v11 = vmul.f32 %v3356_v51, %v435_v39  ;;  %2801 = vmatprep.subr.bf16.mxu0 %v4447_v33  ;;  %v3849_v60 = vmul.f32 %v3361_v52, %v435_v39  ;;  %v442_v39 = vpop.f32.mrb[27].mxu1 }
 0x139   :  { %2810 = vmatprep.subr.bf16.mxu1 %v4447_v33  ;;  %v3852_v19 = vmul.f32 %v3345_v48, %v437_v42  ;;  %v3855_v14 = vmul.f32 %v3351_v50, %v437_v42  ;;  %2456 = vmatprep.mubr.msk.f32.mxu1 %vm3133_vm2, %v4472_v38  ;;  %v3860_v8 = vmul.f32 %v3356_v51, %v437_v42 }
 0x13a   :  { %v3863_v53 = vmul.f32 %v3361_v52, %v437_v42  ;;  %v441_v31 = vadd.f32 %v440_v10, %v3338_v45  ;;  %v443_v30 = vadd.f32 %v442_v39, %v3340_v46  ;;  %v4486_v13 = vpack.c.bf16 %v3633_v12, %v3599_v32 }
 0x13b   :  { %4483 = vst [vmem:[#allocation67_spill] sm:$0xff] %v3855_v14  ;;  %v446_v15 = vpop.f32.mrb[28].mxu1 }
 0x13c   :  { %v3872_v20 = vmul.f32 %v3367_v55, %v441_v31  ;;  %v3875_v3 = vmul.f32 %v3384_v61, %v441_v31  ;;  %v3878_v42 = vmul.f32 %v3389_v62, %v441_v31  ;;  %v3881_v10 = vmul.f32 %v3394_v63, %v441_v31  ;;  %v448_v26 = vpop.f32.mrb[29].mxu1 }
 0x13d   :  { %v3884_v4 = vmul.f32 %v3367_v55, %v443_v30  ;;  %v3887_v39 = vmul.f32 %v3384_v61, %v443_v30  ;;  %v3890_v44 = vmul.f32 %v3389_v62, %v443_v30  ;;  %v3893_v47 = vmul.f32 %v3394_v63, %v443_v30 }
 0x13e   :  { %v447_v37 = vadd.f32 %v446_v15, %v3338_v45  ;;  %v449_v6 = vadd.f32 %v448_v26, %v3340_v46  ;;  %v4485_v31 = vpack.c.bf16 %v3561_v28, %v3524_v1 }
 0x13f   :  { %4484 = vst [vmem:[#allocation68_spill] sm:$0xff] %v3887_v39  ;;  %v452_v12 = vpop.f32.mrb[30].mxu1 }
 0x140   :  { %2803 = vmatpush3.bf16.xpose.msra.mxu0 %v4485_v31  ;;  %2812 = vmatpush3.bf16.xpose.msra.mxu1 %v4486_v13  ;;  %v3916_v36 = vmul.f32 %v3345_v48, %v447_v37  ;;  %v3919_v26 = vmul.f32 %v3351_v50, %v447_v37  ;;  %v3922_v54 = vmul.f32 %v3356_v51, %v447_v37  ;;  %v454_v30 = vpop.f32.mrb[31].mxu1 }
 0x141   :  { %2804 = vmatprep.subr.bf16.mxu0 %v4447_v33  ;;  %2813 = vmatprep.subr.bf16.mxu1 %v4447_v33  ;;  %v3927_v1 = vmul.f32 %v3361_v52, %v447_v37  ;;  %v3930_v28 = vmul.f32 %v3345_v48, %v449_v6  ;;  %v3933_v32 = vmul.f32 %v3351_v50, %v449_v6 }
 0x142   :  { %v3936_v13 = vmul.f32 %v3356_v51, %v449_v6  ;;  %v3939_v31 = vmul.f32 %v3361_v52, %v449_v6  ;;  %v453_v15 = vadd.f32 %v452_v12, %v3338_v45  ;;  %v455_v14 = vadd.f32 %v454_v30, %v3340_v46 }
 0x144   :  { %v522_v50 = vmul.f32 %v3367_v55, %v453_v15  ;;  %v524_v39 = vmul.f32 %v3384_v61, %v453_v15  ;;  %v526_v51 = vmul.f32 %v3389_v62, %v453_v15  ;;  %v528_v52 = vmul.f32 %v3394_v63, %v453_v15 }
 0x145   :  { %v3952_v6 = vmul.f32 %v3367_v55, %v455_v14  ;;  %v3955_v45 = vmul.f32 %v3384_v61, %v455_v14  ;;  %v3958_v12 = vmul.f32 %v3389_v62, %v455_v14  ;;  %v3961_v46 = vmul.f32 %v3394_v63, %v455_v14 }
 0x146   :  { %v2856_v30 = vpack.c.bf16 %v522_v50, %v3916_v36  ;;  %v2859_v48 = vpack.c.bf16 %v524_v39, %v3919_v26  ;;  %v2862_v37 = vpack.c.bf16 %v526_v51, %v3922_v54  ;;  %v2865_v15 = vpack.c.bf16 %v528_v52, %v3927_v1 }
 0x147   :  { %v2968_v55 = vpack.c.bf16 %v3952_v6, %v3930_v28  ;;  %v2971_v61 = vpack.c.bf16 %v3955_v45, %v3933_v32  ;;  %v2974_v62 = vpack.c.bf16 %v3958_v12, %v3936_v13  ;;  %v2977_v63 = vpack.c.bf16 %v3961_v46, %v3939_v31  ;;  %v4581_v28 = vld [vmem:[#allocation68_spill] sm:$0xff]  ;;  %v4582_v6 = vld [vmem:[#allocation67_spill] sm:$0xff] }
 0x148   :  { %v4487_v36 = vpack.c.bf16 %v3564_v43, %v3529_v49  ;;  %v4488_v54 = vpack.c.bf16 %v3636_v17, %v3604_v21  ;;  %v3985_v14 = vadd.f32 %v3470_v40, %v3441_v27  ;;  %v4489_v39 = vpack.c.bf16 %v3639_v23, %v3622_v34  ;;  %v4498_v43 = vld [vmem:[#allocation62_spill] sm:$0xff]  ;;  %v4499_v21 = vld [vmem:[#allocation56_spill] sm:$0xff] }
 0x149   :  { %v4490_v49 = vpack.c.bf16 %v3710_v18, %v3674_v22  ;;  %v4000_v17 = vadd.f32 %v3436_v24, %v3470_v40  ;;  %v4491_v27 = vpack.c.bf16 %v3713_v41, %v3677_v35  ;;  %v4492_v34 = vpack.c.bf16 %v3793_v9, %v3755_v16  ;;  %v4502_v35 = vld [vmem:[#allocation23_spill] sm:$0xff] }
 0x14a   :  { %2806 = vmatpush3.bf16.xpose.msra.mxu0 %v4487_v36  ;;  %2815 = vmatpush3.bf16.xpose.msra.mxu1 %v4488_v54  ;;  %v4493_v24 = vpack.c.bf16 %v3716_v2, %v3680_v58  ;;  %v4494_v40 = vpack.c.bf16 %v3796_v57, %v3758_v59  ;;  %v4495_v16 = vpack.c.bf16 %v3719_v25, %v3685_v7  ;;  %v4497_v58 = vld [vmem:[#allocation28_spill] sm:$0xff]  ;;  %v4506_v2 = vld [vmem:[#allocation34_spill] sm:$0xff]  ;;  %v4507_v9 = vld [vmem:[#allocation15_spill] sm:$0xff] }
 0x14b   :  { %2816 = vmatprep.subr.bf16.mxu1 %v4447_v33  ;;  %2819 = vmatprep.subr.bf16.mxu0 %v4447_v33  ;;  %v4496_v22 = vpack.c.bf16 %v3799_v29, %v3761_v5  ;;  %v4500_v23 = vpack.c.bf16 %v4498_v43, %v4499_v21  ;;  %v4501_v18 = vpack.c.bf16 %v3872_v20, %v3838_v0  ;;  %v4508_v5 = vld [vmem:[#allocation11_spill] sm:$0xff]  ;;  %v4511_v57 = vld [vmem:[#allocation12_spill] sm:$0xff]  ;;  %v4513_v20 = vld [vmem:[#allocation29_spill] sm:$0xff] }
 0x14c   :  { %v4503_v7 = vpack.c.bf16 %v3875_v3, %v3841_v56  ;;  %v4504_v25 = vpack.c.bf16 %v3878_v42, %v3844_v11  ;;  %v4505_v41 = vpack.c.bf16 %v3881_v10, %v3849_v60  ;;  %v4509_v59 = vpack.c.bf16 %v4507_v9, %v4508_v5  ;;  %v4510_v3 = vld [vmem:[#allocation16_spill] sm:$0xff]  ;;  %v4514_v0 = vld [vmem:[#allocation17_spill] sm:$0xff]  ;;  %v4517_v60 = vld [vmem:[#allocation18_spill] sm:$0xff] }
 0x14d   :  { %v4512_v29 = vpack.c.bf16 %v4510_v3, %v4511_v57  ;;  %v4515_v11 = vld [vmem:[#allocation13_spill] sm:$0xff]  ;;  %v4518_v42 = vld [vmem:[#allocation14_spill] sm:$0xff]  ;;  %v1216_v21 = vld [vmem:[%s4354_s9 + $0x30] sm:$0xff]  ;;  %v4585_v45 = vpack.c.bf16 %v3893_v47, %v3863_v53 }
 0x14e   :  { %v4516_v56 = vpack.c.bf16 %v4514_v0, %v4515_v11  ;;  %v4519_v10 = vpack.c.bf16 %v4517_v60, %v4518_v42  ;;  %v1211_v36 = vld [vmem:[%s4354_s9 + $0x8] sm:$0xff] }
 0x151   :  { %2438 = vmatmul.mubr.f32.vlgmr.msra.gmra.mrb[10].mxu0 %v3985_v14 }
 0x152   :  { %2818 = vmatpush3.bf16.xpose.msra.mxu1 %v4489_v39  ;;  %2821 = vmatpush3.bf16.xpose.msra.mxu0 %v4490_v49  ;;  %v1212_v39 = vld [vmem:[%s4354_s9 + $0x10] sm:$0xff]  ;;  %v1213_v49 = vld [vmem:[%s4354_s9 + $0x18] sm:$0xff] }
 0x153   :  { %2822 = vmatprep.subr.bf16.mxu0 %v4447_v33  ;;  %2831 = vmatprep.subr.bf16.mxu1 %v4447_v33 }
 0x154   :  { %2475 = vmatprep.mubr.msk.f32.mxu0 %vm3133_vm2, %v4472_v38 }
 0x159   :  { %2457 = vmatmul.mubr.f32.vlgmr.msra.gmra.mrb[34].mxu1 %v4000_v17 }
 0x15a   :  { %2824 = vmatpush3.bf16.xpose.msra.mxu0 %v4491_v27  ;;  %2833 = vmatpush3.bf16.xpose.msra.mxu1 %v4492_v34  ;;  %v2871_v27 = vpack.c.bf16 %v1213_v49, %v1212_v39  ;;  %v1214_v34 = vld [vmem:[%s4354_s9 + $0x20] sm:$0xff] }
 0x15b   :  { %2825 = vmatprep.subr.bf16.mxu0 %v4447_v33  ;;  %2834 = vmatprep.subr.bf16.mxu1 %v4447_v33 }
 0x15c   :  { %2494 = vmatprep.mubr.msk.f32.mxu1 %vm3133_vm2, %v4472_v38 }
 0x162   :  { %2827 = vmatpush3.bf16.xpose.msra.mxu0 %v4493_v24  ;;  %2836 = vmatpush3.bf16.xpose.msra.mxu1 %v4494_v40  ;;  %v1215_v24 = vld [vmem:[%s4354_s9 + $0x28] sm:$0xff] }
 0x163   :  { %2828 = vmatprep.subr.bf16.mxu0 %v4447_v33  ;;  %2837 = vmatprep.subr.bf16.mxu1 %v4447_v33  ;;  %v2875_v40 = vpack.c.bf16 %v1215_v24, %v1214_v34 }
 0x16a   :  { %2830 = vmatpush3.bf16.xpose.msra.mxu0 %v4495_v16  ;;  %2839 = vmatpush3.bf16.xpose.msra.mxu1 %v4496_v22 }
 0x16b   :  { %2840 = vmatprep.subr.bf16.mxu1 %v4447_v33  ;;  %2843 = vmatprep.subr.bf16.mxu0 %v4447_v33 }
 0x171   :  { %2476 = vmatmul.mubr.f32.vlgmr.msra.gmra.mrb[12].mxu0 %v4497_v58 }
 0x172   :  { %2842 = vmatpush3.bf16.xpose.msra.mxu1 %v4500_v23  ;;  %2845 = vmatpush3.bf16.xpose.msra.mxu0 %v4501_v18  ;;  %v1217_v23 = vld [vmem:[%s4354_s9 + $0x38] sm:$0xff] }
 0x173   :  { %2846 = vmatprep.subr.bf16.mxu0 %v4447_v33  ;;  %2855 = vmatprep.subr.bf16.mxu1 %v4447_v33  ;;  %v2879_v18 = vpack.c.bf16 %v1217_v23, %v1216_v21  ;;  %v4523_v21 = vld [vmem:[#allocation25_spill] sm:$0xff] }
 0x174   :  { %2513 = vmatprep.mubr.msk.f32.mxu0 %vm3133_vm2, %v4472_v38 }
 0x179   :  { %2495 = vmatmul.mubr.f32.vlgmr.msra.gmra.mrb[36].mxu1 %v4502_v35 }
 0x17a   :  { %2848 = vmatpush3.bf16.xpose.msra.mxu0 %v4503_v7  ;;  %2857 = vmatpush3.bf16.xpose.msra.mxu1 %v2856_v30 }
 0x17b   :  { %2849 = vmatprep.subr.bf16.mxu0 %v4447_v33  ;;  %2858 = vmatprep.subr.bf16.mxu1 %v4447_v33 }
 0x17c   :  { %2532 = vmatprep.mubr.msk.f32.mxu1 %vm3133_vm2, %v4472_v38 }
 0x182   :  { %2851 = vmatpush3.bf16.xpose.msra.mxu0 %v4504_v25  ;;  %2860 = vmatpush3.bf16.xpose.msra.mxu1 %v2859_v48 }
 0x183   :  { %2852 = vmatprep.subr.bf16.mxu0 %v4447_v33  ;;  %2861 = vmatprep.subr.bf16.mxu1 %v4447_v33 }
 0x18a   :  { %2854 = vmatpush3.bf16.xpose.msra.mxu0 %v4505_v41  ;;  %2863 = vmatpush3.bf16.xpose.msra.mxu1 %v2862_v37 }
 0x18b   :  { %2864 = vmatprep.subr.bf16.mxu1 %v4447_v33  ;;  %2883 = vmatprep.subr.bf16.mxu0 %v4447_v33 }
 0x191   :  { %2514 = vmatmul.mubr.f32.vlgmr.msra.gmra.mrb[14].mxu0 %v4506_v2 }
 0x192   :  { %2866 = vmatpush3.bf16.xpose.msra.mxu1 %v2865_v15  ;;  %2885 = vmatpush3.bf16.msra.mxu0 %v4509_v59  ;;  %v1210_v15 = vld [vmem:[%s4354_s9] sm:$0xff] }
 0x193   :  { %2886 = vmatprep.subr.bf16.mxu0 %v4447_v33  ;;  %2579 = vmatprep.mubr.msk.f32.mxu0 %vm3133_vm2, %v4472_v38  ;;  %v2867_v54 = vpack.c.bf16 %v1211_v36, %v1210_v15 }
 0x195   :  { %2868 = vmatprep.subr.bf16.mxu1 %v2867_v54 }
 0x196   :  { %2888 = vmatpush3.bf16.msra.mxu0 %v4512_v29 }
 0x197   :  { %2889 = vmatprep.subr.bf16.mxu0 %v4447_v33 }
 0x199   :  { %2533 = vmatmul.mubr.f32.vlgmr.msra.gmra.mrb[38].mxu1 %v4513_v20 }
 0x19a   :  { %2891 = vmatpush3.bf16.msra.mxu0 %v4516_v56  ;;  %2870 = vmatpush3.bf16.msra.mxu1 %v2867_v54 }
 0x19b   :  { %2892 = vmatprep.subr.bf16.mxu0 %v4447_v33  ;;  %2872 = vmatprep.subr.bf16.mxu1 %v2871_v27 }
 0x19e   :  { %2894 = vmatpush3.bf16.msra.mxu0 %v4519_v10  ;;  %2874 = vmatpush3.bf16.msra.mxu1 %v2871_v27 }
 0x19f   :  { %2907 = vmatprep.subr.bf16.mxu0 %v4447_v33  ;;  %2876 = vmatprep.subr.bf16.mxu1 %v2875_v40 }
 0x1a2   :  { %2878 = vmatpush3.bf16.msra.mxu1 %v2875_v40  ;;  %v4520_v40 = vld [vmem:[#allocation24_spill] sm:$0xff] }
 0x1a3   :  { %2880 = vmatprep.subr.bf16.mxu1 %v2879_v18 }
 0x1a6   :  { %2882 = vmatpush3.bf16.msra.mxu1 %v2879_v18  ;;  %v4526_v18 = vld [vmem:[#allocation26_spill] sm:$0xff] }
 0x1a7   :  { %2895 = vmatprep.subr.bf16.mxu1 %v4447_v33 }
 0x201   :  { %v659_v26 = vpop.f32.mrb[8].mxu0 }
 0x202   :  { %v1153_v1 = vmul.f32 0.088388346, %v659_v26  ;;  %v2401_v37 = vpop.f32.mrb[9].mxu0 }
 0x204   :  { %v1162_v48 = vsel %vm1161_vm3, %v1153_v1, -inf }
 0x205   :  { %1163 = vmax.xlane.f32.xlu0 %v1162_v48 }
 0x20a   :  { %v729_v50 = vpop.f32.mrb[32].mxu1 }
 0x20b   :  { %v1154_v51 = vmul.f32 0.088388346, %v729_v50  ;;  %v2420_v52 = vpop.f32.mrb[33].mxu1 }
 0x20d   :  { %v1165_v30 = vsel %vm1161_vm3, %v1154_v51, -inf }
 0x20e   :  { %1166 = vmax.xlane.f32.xlu0 %v1165_v30 }
 0x224   :  { %v799_v16 = vpop.f32.mrb[10].mxu0 }
 0x225   :  { %v1155_v22 = vmul.f32 0.088388346, %v799_v16  ;;  %v2439_v43 = vpop.f32.mrb[11].mxu0  ;;  %v4521_v16 = vld [vmem:[#allocation19_spill] sm:$0xff] }
 0x226   :  { %v4522_v43 = vpack.c.bf16 %v4520_v40, %v4521_v16 }
 0x227   :  { %v1168_v7 = vsel %vm1161_vm3, %v1155_v22, -inf }
 0x228   :  { %1169 = vmax.xlane.f32.xlu1 %v1168_v7  ;;  %v4527_v7 = vld [vmem:[#allocation21_spill] sm:$0xff] }
 0x22c   :  { %v869_v25 = vpop.f32.mrb[34].mxu1 }
 0x22d   :  { %v1156_v41 = vmul.f32 0.088388346, %v869_v25  ;;  %v2458_v9 = vpop.f32.mrb[35].mxu1  ;;  %v4528_v25 = vpack.c.bf16 %v4526_v18, %v4527_v7  ;;  %v4533_v18 = vld [vmem:[#allocation39_spill] sm:$0xff] }
 0x22f   :  { %v1171_v5 = vsel %vm1161_vm3, %v1156_v41, -inf }
 0x230   :  { %1172 = vmax.xlane.f32.xlu1 %v1171_v5 }
 0x244   :  { %v939_v59 = vpop.f32.mrb[12].mxu0 }
 0x245   :  { %v1157_v3 = vmul.f32 0.088388346, %v939_v59  ;;  %v2477_v57 = vpop.f32.mrb[13].mxu0  ;;  %v4529_v59 = vld [vmem:[#allocation27_spill] sm:$0xff] }
 0x246   :  { %v4530_v57 = vld [vmem:[#allocation22_spill] sm:$0xff] }
 0x247   :  { %v1174_v29 = vsel %vm1161_vm3, %v1157_v3, -inf }
 0x248   :  { %1175 = vmax.xlane.f32.xlu0 %v1174_v29  ;;  %v4531_v29 = vpack.c.bf16 %v4529_v59, %v4530_v57  ;;  %v4541_v57 = vld [vmem:[#allocation36_spill] sm:$0xff] }
 0x24c   :  { %v1009_v0 = vpop.f32.mrb[36].mxu1 }
 0x24d   :  { %v1158_v11 = vmul.f32 0.088388346, %v1009_v0  ;;  %v2496_v56 = vpop.f32.mrb[37].mxu1 }
 0x24f   :  { %v1177_v60 = vsel %vm1161_vm3, %v1158_v11, -inf }
 0x250   :  { %1178 = vmax.xlane.f32.xlu1 %v1177_v60 }
 0x264   :  { %v1079_v42 = vpop.f32.mrb[14].mxu0 }
 0x265   :  { %v1159_v10 = vmul.f32 0.088388346, %v1079_v42  ;;  %v2515_v26 = vpop.f32.mrb[15].mxu0 }
 0x267   :  { %v1180_v37 = vsel %vm1161_vm3, %v1159_v10, -inf }
 0x268   :  { %1181 = vmax.xlane.f32.xlu0 %v1180_v37 }
 0x26c   :  { %v1149_v48 = vpop.f32.mrb[38].mxu1 }
 0x26d   :  { %v1160_v50 = vmul.f32 0.088388346, %v1149_v48  ;;  %v2534_v52 = vpop.f32.mrb[39].mxu1 }
 0x26f   :  { %v1183_v30 = vsel %vm1161_vm3, %v1160_v50, -inf }
 0x270   :  { %1184 = vmax.xlane.f32.xlu1 %v1183_v30 }
 0x292   :  { %v1164_v15 = vpop.xlane.xlu0 %1163 }
 0x293   :  { %v1186_v36 = vsub.f32 %v1153_v1, %v1164_v15  ;;  %v4524_v1 = vld [vmem:[#allocation20_spill] sm:$0xff] }
 0x294   :  { %v4525_v23 = vpack.c.bf16 %v4523_v21, %v4524_v1 }
 0x295   :  { %v1194_v54 = vmul.f32 1.442695, %v1186_v36 }
 0x297   :  { %3021 = vpow2.f32 %v1194_v54 }
 0x29b   :  { %v1167_v39 = vpop.xlane.xlu0 %1166 }
 0x29c   :  { %v1187_v49 = vsub.f32 %v1154_v51, %v1167_v39 }
 0x29e   :  { %v1196_v27 = vmul.f32 1.442695, %v1187_v49 }
 0x2a0   :  { %3023 = vpow2.f32 %v1196_v27 }
 0x2a1   :  { %v3022_v34 = vpop.eup %3021 }
 0x2a2   :  { %2551 = vmatprep.mubr.msk.f32.mxu1 %vm1161_vm3, %v3022_v34 }
 0x2aa   :  { %v3024_v24 = vpop.eup %3023 }
 0x2ab   :  { %2552 = vmatmul.mubr.msk.f32.vlgmr.msra.gmra.mrb[40].mxu1 %vm1161_vm3, %v3024_v24 }
 0x2ac   :  { %2897 = vmatpush3.bf16.msra.mxu1 %v4522_v43 }
 0x2ad   :  { %2898 = vmatprep.subr.bf16.mxu1 %v4447_v33 }
 0x2b0   :  { %2900 = vmatpush3.bf16.msra.mxu1 %v4525_v23 }
 0x2b1   :  { %2901 = vmatprep.subr.bf16.mxu1 %v4447_v33 }
 0x2b4   :  { %2903 = vmatpush3.bf16.msra.mxu1 %v4528_v25  ;;  %v4535_v25 = vld [vmem:[#allocation35_spill] sm:$0xff] }
 0x2b5   :  { %v1170_v51 = vpop.xlane.xlu1 %1169  ;;  %2904 = vmatprep.subr.bf16.mxu1 %v4447_v33 }
 0x2b6   :  { %v1188_v9 = vsub.f32 %v1155_v22, %v1170_v51  ;;  %v4532_v51 = vld [vmem:[#allocation43_spill] sm:$0xff] }
 0x2b7   :  { %v4534_v7 = vpack.c.bf16 %v4532_v51, %v4533_v18  ;;  %v4559_v18 = vld [vmem:[#allocation52_spill] sm:$0xff] }
 0x2b8   :  { %v1198_v5 = vmul.f32 1.442695, %v1188_v9  ;;  %2906 = vmatpush3.bf16.msra.mxu1 %v4531_v29  ;;  %v4536_v9 = vld [vmem:[#allocation30_spill] sm:$0xff]  ;;  %v4542_v29 = vld [vmem:[#allocation31_spill] sm:$0xff] }
 0x2b9   :  { %2919 = vmatprep.subr.bf16.mxu1 %v4447_v33 }
 0x2ba   :  { %3025 = vpow2.f32 %v1198_v5  ;;  %v4537_v5 = vpack.c.bf16 %v4535_v25, %v4536_v9 }
 0x2bd   :  { %v1173_v0 = vpop.xlane.xlu1 %1172 }
 0x2be   :  { %v1189_v56 = vsub.f32 %v1156_v41, %v1173_v0  ;;  %v4543_v0 = vpack.c.bf16 %v4541_v57, %v4542_v29  ;;  %v4569_v57 = vld [vmem:[#allocation59_spill] sm:$0xff] }
 0x2c0   :  { %v1200_v60 = vmul.f32 1.442695, %v1189_v56  ;;  %v4544_v56 = vld [vmem:[#allocation45_spill] sm:$0xff] }
 0x2c2   :  { %3027 = vpow2.f32 %v1200_v60  ;;  %v4545_v60 = vld [vmem:[#allocation41_spill] sm:$0xff] }
 0x2c4   :  { %v4129_v42 = vpop.eup %3025 }
 0x2c5   :  { %2554 = vmatprep.mubr.msk.f32.mxu1 %vm1161_vm3, %v4129_v42 }
 0x2cc   :  { %v3028_v22 = vpop.eup %3027 }
 0x2cd   :  { %2555 = vmatmul.mubr.msk.f32.gmra.mrb[42].mxu1 %vm1161_vm3, %v3028_v22 }
 0x2d5   :  { %v1176_v26 = vpop.xlane.xlu0 %1175 }
 0x2d6   :  { %v1190_v37 = vsub.f32 %v1157_v3, %v1176_v26  ;;  %v4546_v26 = vpack.c.bf16 %v4544_v56, %v4545_v60  ;;  %v4572_v56 = vld [vmem:[#allocation49_spill] sm:$0xff] }
 0x2d8   :  { %v1202_v48 = vmul.f32 1.442695, %v1190_v37  ;;  %v4547_v37 = vld [vmem:[#allocation37_spill] sm:$0xff] }
 0x2da   :  { %3029 = vpow2.f32 %v1202_v48  ;;  %v4548_v48 = vld [vmem:[#allocation32_spill] sm:$0xff] }
 0x2dd   :  { %v1179_v52 = vpop.xlane.xlu1 %1178 }
 0x2de   :  { %v1191_v30 = vsub.f32 %v1158_v11, %v1179_v52  ;;  %v4549_v52 = vpack.c.bf16 %v4547_v37, %v4548_v48  ;;  %v4575_v37 = vld [vmem:[#allocation60_spill] sm:$0xff] }
 0x2e0   :  { %v1204_v15 = vmul.f32 1.442695, %v1191_v30  ;;  %v4550_v30 = vld [vmem:[#allocation46_spill] sm:$0xff] }
 0x2e2   :  { %3031 = vpow2.f32 %v1204_v15  ;;  %v4551_v15 = vld [vmem:[#allocation42_spill] sm:$0xff] }
 0x2e4   :  { %v4134_v36 = vpop.eup %3029 }
 0x2e5   :  { %2557 = vmatprep.mubr.msk.f32.mxu1 %vm1161_vm3, %v4134_v36 }
 0x2ec   :  { %v4138_v41 = vpop.eup %3031 }
 0x2ed   :  { %2558 = vmatmul.mubr.msk.f32.gmra.mrb[44].mxu1 %vm1161_vm3, %v4138_v41 }
 0x2f5   :  { %v1182_v54 = vpop.xlane.xlu0 %1181 }
 0x2f6   :  { %v1192_v39 = vsub.f32 %v1159_v10, %v1182_v54  ;;  %v4552_v54 = vpack.c.bf16 %v4550_v30, %v4551_v15  ;;  %v4578_v30 = vld [vmem:[#allocation50_spill] sm:$0xff] }
 0x2f8   :  { %v1206_v49 = vmul.f32 1.442695, %v1192_v39  ;;  %v4553_v39 = vld [vmem:[#allocation38_spill] sm:$0xff] }
 0x2fa   :  { %3033 = vpow2.f32 %v1206_v49  ;;  %v4554_v49 = vld [vmem:[#allocation33_spill] sm:$0xff] }
 0x2fd   :  { %v1185_v3 = vpop.xlane.xlu1 %1184 }
 0x2fe   :  { %v1193_v27 = vsub.f32 %v1160_v50, %v1185_v3  ;;  %v4555_v3 = vpack.c.bf16 %v4553_v39, %v4554_v49 }
 0x300   :  { %v1208_v40 = vmul.f32 1.442695, %v1193_v27 }
 0x302   :  { %3035 = vpow2.f32 %v1208_v40 }
 0x304   :  { %v4142_v11 = vpop.eup %3033 }
 0x305   :  { %2560 = vmatprep.mubr.msk.f32.mxu1 %vm1161_vm3, %v4142_v11 }
 0x30c   :  { %v4146_v16 = vpop.eup %3035 }
 0x30d   :  { %2561 = vmatmul.mubr.msk.f32.gmra.mrb[46].mxu1 %vm1161_vm3, %v4146_v16 }
 0x30e   :  { %2598 = vmatprep.mubr.msk.f32.mxu1 %vm3133_vm2, %v4472_v38 }
 0x37e   :  { %v2553_v10 = vpop.f32.mrb[40].mxu1 }
 0x37f   :  { %3037 = vrcp.f32 %v2553_v10  ;;  %v1308_v43 = vpop.f32.mrb[41].mxu1 }
 0x380   :  { %3039 = vrcp.f32 %v1308_v43 }
 0x389   :  { %v3038_v50 = vpop.eup %3037 }
 0x38a   :  { %v3040_v21 = vpop.eup %3039  ;;  %v1356_v1 = vmul.f32 %v3038_v50, %v3024_v24  ;;  %v4539_v24 = vld [vmem:[#allocation40_spill] sm:$0xff] }
 0x38b   :  { %v1355_v23 = vmul.f32 %v3040_v21, %v3022_v34  ;;  %v4538_v34 = vld [vmem:[#allocation44_spill] sm:$0xff] }
 0x38c   :  { %2599 = vmatmul.mubr.msk.f32.vlgmr.msra.gmra.mrb[48].mxu1 %vm1161_vm3, %v1356_v1  ;;  %v4540_v59 = vpack.c.bf16 %v4538_v34, %v4539_v24  ;;  %v4556_v1 = vld [vmem:[#allocation63_spill] sm:$0xff]  ;;  %v4566_v34 = vld [vmem:[#allocation48_spill] sm:$0xff] }
 0x38d   :  { %2921 = vmatpush3.bf16.msra.mxu1 %v4534_v7  ;;  %2580 = vmatmul.mubr.msk.f32.vlgmr.msra.gmra.mrb[16].mxu0 %vm1161_vm3, %v1355_v23  ;;  %v4557_v23 = vld [vmem:[#allocation57_spill] sm:$0xff]  ;;  %v4560_v7 = vld [vmem:[#allocation47_spill] sm:$0xff] }
 0x38e   :  { %2909 = vmatpush3.bf16.msra.mxu0 %v4537_v5  ;;  %2922 = vmatprep.subr.bf16.mxu1 %v4447_v33  ;;  %v4558_v51 = vpack.c.bf16 %v4556_v1, %v4557_v23  ;;  %v4561_v25 = vpack.c.bf16 %v4559_v18, %v4560_v7  ;;  %v4565_v5 = vld [vmem:[#allocation53_spill] sm:$0xff]  ;;  %v1966_v1 = vld [vmem:[%s4351_s6 + $0x58] sm:$0xff]  ;;  %v1968_v18 = vld [vmem:[%s4351_s6 + $0x68] sm:$0xff] }
 0x38f   :  { %2910 = vmatprep.subr.bf16.mxu0 %v4447_v33  ;;  %2636 = vmatprep.mubr.msk.f32.mxu1 %vm3133_vm2, %v4472_v38  ;;  %v4567_v24 = vpack.c.bf16 %v4565_v5, %v4566_v34 }
 0x390   :  { %2617 = vmatprep.mubr.msk.f32.mxu0 %vm3133_vm2, %v4472_v38 }
 0x391   :  { %2924 = vmatpush3.bf16.msra.mxu1 %v4540_v59  ;;  %v4568_v59 = vld [vmem:[#allocation65_spill] sm:$0xff] }
 0x392   :  { %2912 = vmatpush3.bf16.msra.mxu0 %v4543_v0  ;;  %2925 = vmatprep.subr.bf16.mxu1 %v4447_v33  ;;  %v4570_v29 = vpack.c.bf16 %v4568_v59, %v4569_v57  ;;  %v4571_v0 = vld [vmem:[#allocation54_spill] sm:$0xff] }
 0x393   :  { %2913 = vmatprep.subr.bf16.mxu0 %v4447_v33  ;;  %v4573_v60 = vpack.c.bf16 %v4571_v0, %v4572_v56 }
 0x395   :  { %2927 = vmatpush3.bf16.msra.mxu1 %v4546_v26  ;;  %v4574_v26 = vld [vmem:[#allocation66_spill] sm:$0xff] }
 0x396   :  { %2915 = vmatpush3.bf16.msra.mxu0 %v4549_v52  ;;  %2928 = vmatprep.subr.bf16.mxu1 %v4447_v33  ;;  %v4576_v48 = vpack.c.bf16 %v4574_v26, %v4575_v37  ;;  %v4577_v52 = vld [vmem:[#allocation55_spill] sm:$0xff] }
 0x397   :  { %2916 = vmatprep.subr.bf16.mxu0 %v4447_v33  ;;  %v4579_v15 = vpack.c.bf16 %v4577_v52, %v4578_v30 }
 0x399   :  { %2930 = vmatpush3.bf16.msra.mxu1 %v4552_v54 }
 0x39a   :  { %2918 = vmatpush3.bf16.msra.mxu0 %v4555_v3  ;;  %2943 = vmatprep.subr.bf16.mxu1 %v4447_v33 }
 0x39b   :  { %2931 = vmatprep.subr.bf16.mxu0 %v4447_v33 }
 0x3a0   :  { %v2556_v27 = vpop.f32.mrb[42].mxu1 }
 0x3a1   :  { %3041 = vrcp.f32 %v2556_v27  ;;  %v1318_v40 = vpop.f32.mrb[43].mxu1 }
 0x3a2   :  { %3043 = vrcp.f32 %v1318_v40 }
 0x3ab   :  { %v3042_v10 = vpop.eup %3041 }
 0x3ac   :  { %v3044_v43 = vpop.eup %3043  ;;  %v1358_v50 = vmul.f32 %v3042_v10, %v3028_v22  ;;  %v4563_v22 = vld [vmem:[#allocation58_spill] sm:$0xff]  ;;  %v4580_v10 = vpack.c.bf16 %v3884_v4, %v3852_v19  ;;  %v1955_v4 = vld [vmem:[%s4351_s6] sm:$0xff]  ;;  %v4584_v19 = vpack.c.bf16 %v3890_v44, %v3860_v8  ;;  %v1957_v44 = vld [vmem:[%s4351_s6 + $0x10] sm:$0xff] }
 0x3ad   :  { %v1357_v21 = vmul.f32 %v3044_v43, %v4129_v42  ;;  %v4562_v42 = vld [vmem:[#allocation64_spill] sm:$0xff]  ;;  %v1964_v43 = vld [vmem:[%s4351_s6 + $0x48] sm:$0xff] }
 0x3ae   :  { %2637 = vmatmul.mubr.msk.f32.vlgmr.msra.gmra.mrb[50].mxu1 %vm1161_vm3, %v1358_v50  ;;  %v4564_v9 = vpack.c.bf16 %v4562_v42, %v4563_v22  ;;  %v1970_v42 = vld [vmem:[%s4351_s6 + $0x78] sm:$0xff] }
 0x3af   :  { %2945 = vmatpush3.bf16.msra.mxu1 %v4558_v51  ;;  %2618 = vmatmul.mubr.msk.f32.vlgmr.msra.gmra.mrb[18].mxu0 %vm1161_vm3, %v1357_v21  ;;  %v1965_v21 = vld [vmem:[%s4351_s6 + $0x50] sm:$0xff]  ;;  %v1967_v51 = vld [vmem:[%s4351_s6 + $0x60] sm:$0xff] }
 0x3b0   :  { %2933 = vmatpush3.bf16.msra.mxu0 %v4561_v25  ;;  %2946 = vmatprep.subr.bf16.mxu1 %v4447_v33  ;;  %v2999_v23 = vpack.c.bf16 %v1966_v1, %v1965_v21  ;;  %v3003_v7 = vpack.c.bf16 %v1968_v18, %v1967_v51  ;;  %v1969_v25 = vld [vmem:[%s4351_s6 + $0x70] sm:$0xff] }
 0x3b1   :  { %2934 = vmatprep.subr.bf16.mxu0 %v4447_v33  ;;  %2674 = vmatprep.mubr.msk.f32.mxu1 %vm3133_vm2, %v4472_v38  ;;  %v3007_v22 = vpack.c.bf16 %v1970_v42, %v1969_v25 }
 0x3b2   :  { %2655 = vmatprep.mubr.msk.f32.mxu0 %vm3133_vm2, %v4472_v38 }
 0x3b3   :  { %2948 = vmatpush3.bf16.msra.mxu1 %v4564_v9 }
 0x3b4   :  { %2936 = vmatpush3.bf16.msra.mxu0 %v4567_v24  ;;  %2949 = vmatprep.subr.bf16.mxu1 %v4447_v33  ;;  %v4586_v24 = vld [vmem:[#allocation51_spill] sm:$0xff] }
 0x3b5   :  { %2937 = vmatprep.subr.bf16.mxu0 %v4447_v33 }
 0x3b7   :  { %2951 = vmatpush3.bf16.msra.mxu1 %v4570_v29  ;;  %v4587_v29 = vld [vmem:[#allocation61_spill] sm:$0xff] }
 0x3b8   :  { %2939 = vmatpush3.bf16.msra.mxu0 %v4573_v60  ;;  %2952 = vmatprep.subr.bf16.mxu1 %v4447_v33 }
 0x3b9   :  { %2940 = vmatprep.subr.bf16.mxu0 %v4447_v33 }
 0x3bb   :  { %2954 = vmatpush3.bf16.msra.mxu1 %v4576_v48 }
 0x3bc   :  { %2942 = vmatpush3.bf16.msra.mxu0 %v4579_v15  ;;  %2967 = vmatprep.subr.bf16.mxu1 %v4447_v33 }
 0x3bd   :  { %2955 = vmatprep.subr.bf16.mxu0 %v4447_v33 }
 0x3c0   :  { %v2559_v54 = vpop.f32.mrb[44].mxu1 }
 0x3c1   :  { %3045 = vrcp.f32 %v2559_v54  ;;  %v1328_v39 = vpop.f32.mrb[45].mxu1 }
 0x3c2   :  { %3047 = vrcp.f32 %v1328_v39 }
 0x3cb   :  { %v3046_v49 = vpop.eup %3045 }
 0x3cc   :  { %v3048_v3 = vpop.eup %3047  ;;  %v1360_v27 = vmul.f32 %v3046_v49, %v4138_v41  ;;  %v1962_v41 = vld [vmem:[%s4351_s6 + $0x38] sm:$0xff] }
 0x3cd   :  { %v1359_v40 = vmul.f32 %v3048_v3, %v4134_v36  ;;  %v1961_v36 = vld [vmem:[%s4351_s6 + $0x30] sm:$0xff] }
 0x3ce   :  { %2675 = vmatmul.mubr.msk.f32.vlgmr.msra.gmra.mrb[52].mxu1 %vm1161_vm3, %v1360_v27 }
 0x3cf   :  { %2969 = vmatpush3.bf16.msra.mxu1 %v2968_v55  ;;  %2656 = vmatmul.mubr.msk.f32.vlgmr.msra.gmra.mrb[20].mxu0 %vm1161_vm3, %v1359_v40  ;;  %v4583_v55 = vpack.c.bf16 %v4581_v28, %v4582_v6  ;;  %v2166_v6 = vld [vmem:[%s4352_s7] ss:$0 sm:$0xff]  ;;  %s3134_s7 = smov [#allocation7]  }
 0x3d0   :  { %2957 = vmatpush3.bf16.msra.mxu0 %v4580_v10  ;;  %2970 = vmatprep.subr.bf16.mxu1 %v4447_v33  ;;  %s2112_s20 = sshll.u32 %s3134_s7, 4  ;;  %s2113_s20 = int_to_ptr.vmem [resolvable:$true] %s2112_s20 }
 0x3d1   :  { %2958 = vmatprep.subr.bf16.mxu0 %v4447_v33  ;;  %2712 = vmatprep.mubr.msk.f32.mxu1 %vm3133_vm2, %v4472_v38  ;;  %s3097_s8 = scalar_lea.vmem %s2113_s20, 1024  ;;  %p3102_p3 = scmp.lt.s32.totalorder %s2113_s20, %s2113_s20 }
 0x3d2   :  { %2693 = vmatprep.mubr.msk.f32.mxu0 %vm3133_vm2, %v4472_v38  ;;  %v1956_v38 = vld [vmem:[%s4351_s6 + $0x8] sm:$0xff]  ;;  %p3098_p2 = scmp.ne.s32.totalorder %s2113_s20, %s3097_s8  ;;  %p3103_p4 = scmp.lt.s32.totalorder %s3097_s8, %s3097_s8 }
 0x3d3   :  { %2972 = vmatpush3.bf16.msra.mxu1 %v2971_v61  ;;  %v2979_v32 = vpack.c.bf16 %v1956_v38, %v1955_v4  ;;  %v1959_v61 = vld [vmem:[%s4351_s6 + $0x20] sm:$0xff] }
 0x3d4   :  { %2960 = vmatpush3.bf16.msra.mxu0 %v4583_v55  ;;  %2973 = vmatprep.subr.bf16.mxu1 %v4447_v33  ;;  %p3104_p5 = por %p3103_p4, %p3102_p3 }
 0x3d5   :  { %2961 = vmatprep.subr.bf16.mxu0 %v4447_v33 }
 0x3d6   :  { %p3105_p6 = pnand %p3104_p5, %p3098_p2 }
 0x3d7   :  { %2975 = vmatpush3.bf16.msra.mxu1 %v2974_v62  ;;  %v1960_v62 = vld [vmem:[%s4351_s6 + $0x28] sm:$0xff] }
 0x3d8   :  { %2963 = vmatpush3.bf16.msra.mxu0 %v4584_v19  ;;  %2976 = vmatprep.subr.bf16.mxu1 %v4447_v33 }
 0x3d9   :  { %2964 = vmatprep.subr.bf16.mxu0 %v4447_v33  ;;  %v1958_v33 = vld [vmem:[%s4351_s6 + $0x18] sm:$0xff] }
 0x3da   :  { %v2983_v53 = vpack.c.bf16 %v1958_v33, %v1957_v44 }
 0x3db   :  { %2978 = vmatpush3.bf16.msra.mxu1 %v2977_v63  ;;  %v2987_v63 = vpack.c.bf16 %v1960_v62, %v1959_v61 }
 0x3dc   :  { %2966 = vmatpush3.bf16.msra.mxu0 %v4585_v45 }
 0x3dd   :  { %2980 = vmatprep.subr.bf16.mxu0 %v2979_v32 }
 0x3e0   :  { %v2562_v13 = vpop.f32.mrb[46].mxu1 }
 0x3e1   :  { %3049 = vrcp.f32 %v2562_v13  ;;  %v1338_v12 = vpop.f32.mrb[47].mxu1 }
 0x3e2   :  { %3051 = vrcp.f32 %v1338_v12 }
 0x3eb   :  { %v3050_v8 = vpop.eup %3049 }
 0x3ec   :  { %v3052_v31 = vpop.eup %3051  ;;  %v1362_v46 = vmul.f32 %v3050_v8, %v4146_v16  ;;  %v1963_v16 = vld [vmem:[%s4351_s6 + $0x40] sm:$0xff] }
 0x3ed   :  { %v1361_v47 = vmul.f32 %v3052_v31, %v4142_v11  ;;  %v2991_v11 = vpack.c.bf16 %v1962_v41, %v1961_v36  ;;  %v2995_v50 = vpack.c.bf16 %v1964_v43, %v1963_v16 }
 0x3ee   :  { %2713 = vmatmul.mubr.msk.f32.vlgmr.msra.gmra.mrb[54].mxu1 %vm1161_vm3, %v1362_v46 }
 0x3ef   :  { %2694 = vmatmul.mubr.msk.f32.vlgmr.msra.gmra.mrb[22].mxu0 %vm1161_vm3, %v1361_v47 }
 0x3f0   :  { %2982 = vmatpush3.bf16.msra.mxu0 %v2979_v32 }
 0x3f1   :  { %2984 = vmatprep.subr.bf16.mxu0 %v2983_v53 }
 0x3f4   :  { %2986 = vmatpush3.bf16.msra.mxu0 %v2983_v53 }
 0x3f5   :  { %2988 = vmatprep.subr.bf16.mxu0 %v2987_v63 }
 0x3f8   :  { %2990 = vmatpush3.bf16.msra.mxu0 %v2987_v63 }
 0x3f9   :  { %2992 = vmatprep.subr.bf16.mxu0 %v2991_v11 }
 0x3fc   :  { %2994 = vmatpush3.bf16.msra.mxu0 %v2991_v11 }
 0x3fd   :  { %2996 = vmatprep.subr.bf16.mxu0 %v2995_v50 }
 0x400   :  { %2998 = vmatpush3.bf16.msra.mxu0 %v2995_v50 }
 0x401   :  { %3000 = vmatprep.subr.bf16.mxu0 %v2999_v23 }
 0x404   :  { %3002 = vmatpush3.bf16.msra.mxu0 %v2999_v23 }
 0x405   :  { %3004 = vmatprep.subr.bf16.mxu0 %v3003_v7 }
 0x408   :  { %3006 = vmatpush3.bf16.msra.mxu0 %v3003_v7 }
 0x409   :  { %3008 = vmatprep.subr.bf16.mxu0 %v3007_v22 }
 0x40c   :  { %3010 = vmatpush3.bf16.msra.mxu0 %v3007_v22 }
 0x45f   :  { %v1505_v9 = vpop.f32.mrb[48].mxu1 }
 0x460   :  { %v1432_v5 = vpop.f32.mrb[16].mxu0  ;;  %v2600_v34 = vpop.f32.mrb[49].mxu1  ;;  %v1948_v0 = vadd.f32 %v1505_v9, %v4587_v29 }
 0x461   :  { %v1947_v59 = vadd.f32 %v1432_v5, %v4586_v24  ;;  %v2581_v57 = vpop.f32.mrb[17].mxu0 }
 0x463   :  { %2747 = vmatprep.mubr.f32.mxu0 %v1947_v59 }
 0x464   :  { %2748 = vmatmul.mubr.f32.vlgmr.msra.gmra.mrb[24].mxu0 %v1948_v0 }
 0x481   :  { %v1651_v56 = vpop.f32.mrb[50].mxu1 }
 0x482   :  { %v1578_v60 = vpop.f32.mrb[18].mxu0  ;;  %v2638_v26 = vpop.f32.mrb[51].mxu1  ;;  %v1950_v52 = vadd.f32 %v1651_v56, %v4000_v17 }
 0x483   :  { %v1949_v37 = vadd.f32 %v1578_v60, %v3985_v14  ;;  %v2619_v48 = vpop.f32.mrb[19].mxu0 }
 0x485   :  { %2750 = vmatprep.mubr.f32.mxu0 %v1949_v37 }
 0x486   :  { %2751 = vmatmul.mubr.f32.gmra.mrb[26].mxu0 %v1950_v52 }
 0x4a1   :  { %v1797_v30 = vpop.f32.mrb[52].mxu1 }
 0x4a2   :  { %v1724_v15 = vpop.f32.mrb[20].mxu0  ;;  %v2676_v54 = vpop.f32.mrb[53].mxu1  ;;  %v1952_v3 = vadd.f32 %v1797_v30, %v4502_v35 }
 0x4a3   :  { %v1951_v39 = vadd.f32 %v1724_v15, %v4497_v58  ;;  %v2657_v49 = vpop.f32.mrb[21].mxu0 }
 0x4a5   :  { %2753 = vmatprep.mubr.f32.mxu0 %v1951_v39 }
 0x4a6   :  { %2754 = vmatmul.mubr.f32.gmra.mrb[28].mxu0 %v1952_v3 }
 0x4c1   :  { %v1943_v27 = vpop.f32.mrb[54].mxu1 }
 0x4c2   :  { %v1870_v40 = vpop.f32.mrb[22].mxu0  ;;  %v2714_v10 = vpop.f32.mrb[55].mxu1  ;;  %v1954_v17 = vadd.f32 %v1943_v27, %v4513_v20 }
 0x4c3   :  { %v1953_v14 = vadd.f32 %v1870_v40, %v4506_v2  ;;  %v2695_v28 = vpop.f32.mrb[23].mxu0 }
 0x4c5   :  { %2756 = vmatprep.mubr.f32.mxu0 %v1953_v14 }
 0x4c6   :  { %2757 = vmatmul.mubr.f32.gmra.mrb[30].mxu0 %v1954_v17 }
 0x537   :  { %v2749_v58 = vpop.f32.mrb[24].mxu0 }
 0x538   :  { %v2050_v55 = vadd.f32 %v2749_v58, %v2166_v6  ;;  %v2044_v4 = vpop.f32.mrb[25].mxu0 }
 0x539   :  { %v2045_v35 = vadd.f32 %v2166_v6, %v2044_v4 }
 0x53a   :  { %v2084_v38 = vmax.f32 %v2050_v55, 0.0 }
 0x53b   :  { %v2083_v19 = vmax.f32 %v2045_v35, 0.0 }
 0x53c   :  { %v2092_v32 = vadd.f32 %v2084_v38, %v1948_v0 }
 0x53d   :  { %v2091_v45 = vadd.f32 %v2083_v19, %v1947_v59 }
 0x53e   :  { %2100 = vst [vmem:[#allocation7 + $0x8] sm:$0xff] %v2092_v32 }
 0x53f   :  { %2099 = vst [vmem:[#allocation7] sm:$0xff] %v2091_v45 }
 0x559   :  { %v2752_v2 = vpop.f32.mrb[26].mxu0 }
 0x55a   :  { %v2060_v13 = vadd.f32 %v2752_v2, %v2166_v6  ;;  %v2054_v12 = vpop.f32.mrb[27].mxu0 }
 0x55b   :  { %v2055_v20 = vadd.f32 %v2166_v6, %v2054_v12 }
 0x55c   :  { %v2086_v44 = vmax.f32 %v2060_v13, 0.0 }
 0x55d   :  { %v2085_v33 = vmax.f32 %v2055_v20, 0.0 }
 0x55e   :  { %v2094_v8 = vadd.f32 %v2086_v44, %v1950_v52 }
 0x55f   :  { %v2093_v31 = vadd.f32 %v2085_v33, %v1949_v37 }
 0x560   :  { %2102 = vst [vmem:[#allocation7 + $0x18] sm:$0xff] %v2094_v8 }
 0x561   :  { %2101 = vst [vmem:[#allocation7 + $0x10] sm:$0xff] %v2093_v31 }
 0x579   :  { %v2755_v46 = vpop.f32.mrb[28].mxu0 }
 0x57a   :  { %v2070_v47 = vadd.f32 %v2755_v46, %v2166_v6  ;;  %v2064_v53 = vpop.f32.mrb[29].mxu0 }
 0x57b   :  { %v2065_v61 = vadd.f32 %v2166_v6, %v2064_v53 }
 0x57c   :  { %v2088_v62 = vmax.f32 %v2070_v47, 0.0 }
 0x57d   :  { %v2087_v63 = vmax.f32 %v2065_v61, 0.0 }
 0x57e   :  { %v2096_v36 = vadd.f32 %v2088_v62, %v1952_v3 }
 0x57f   :  { %v2095_v41 = vadd.f32 %v2087_v63, %v1951_v39 }
 0x580   :  { %2104 = vst [vmem:[#allocation7 + $0x28] sm:$0xff] %v2096_v36 }
 0x581   :  { %2103 = vst [vmem:[#allocation7 + $0x20] sm:$0xff] %v2095_v41 }
 0x599   :  { %v2758_v11 = vpop.f32.mrb[30].mxu0 }
 0x59a   :  { %v2080_v16 = vadd.f32 %v2758_v11, %v2166_v6  ;;  %v2074_v43 = vpop.f32.mrb[31].mxu0 }
 0x59b   :  { %v2075_v50 = vadd.f32 %v2166_v6, %v2074_v43 }
 0x59c   :  { %v2090_v21 = vmax.f32 %v2080_v16, 0.0 }
 0x59d   :  { %v2089_v1 = vmax.f32 %v2075_v50, 0.0 }
 0x59e   :  { %v2098_v23 = vadd.f32 %v2090_v21, %v1954_v17 }
 0x59f   :  { %v2097_v51 = vadd.f32 %v2089_v1, %v1953_v14 }
 0x5a0   :  { %2106 = vst [vmem:[#allocation7 + $0x38] sm:$0xff] %v2098_v23 }
 0x5a1   :  { %2105 = vst [vmem:[#allocation7 + $0x30] sm:$0xff] %v2097_v51 }
 0x5a2   :  { %3108 = shalt.err (!%p3105_p6)
}
 0x5a3   :  { %s3109_s22 = scalar_lea.hbm %s4355_s10, 1024 }
 0x5a4   :  { %p3110_p7 = scmp.ne.s32.totalorder %s4355_s10, %s3109_s22  ;;  %p3113_p8 = scmp.lt.u32.totalorder %s3109_s22, %s4355_s10 }
 0x5a6   :  { %p3115_p9 = pnand %p3113_p8, %p3110_p7 }
 0x5a8   :  { %3118 = shalt.err (!%p3115_p9)
}
 0x5a9   :  { %2118 = dma.vmem_to_hbm [thread:$0]  %s2113_s20, 1024, %s4355_s10, [#allocation4], %s3126_s23, %s3126_s23, %s3127_s24  }
 0x5aa   :  { %3123 = dma.done.wait [#allocation4], 1024  }
 0x5ab   :  { %3124 = vsyncadd [#allocation4], 4294966272 }
 0x5ac   :  { %2122 = vsyncpa [#allocation3], 1 }
 0x5ad   :  { %2123 = vsyncpa [#allocation6], 1 }
 0x5ae   :  { %2124 = vsyncpa [#allocation4], 1 }

</bundles_post_ra>
